<compile_context>
chip_gen: v5e
topology: v5e:2x2
jax: 0.10.0
libtpu: 0.0.40
codegen_flags: <defaults>
</compile_context>

<pallas_src>
import jax
import jax.numpy as jnp
from jax import lax
from jax.experimental import pallas as pl
from jax.experimental.pallas import tpu as pltpu

EPS = 1e-5  # nn.InstanceNorm2d default eps


def _make_resblock_kernel(N, C, H, W):
    """Builds the fused ResBlock kernel for a fixed (N, C, H, W)."""
    assert W > 0 and (W & (W - 1)) == 0, "kernel assumes power-of-two width"
    HW = H * W
    log2_w = W.bit_length() - 1
    offs = [(dh, dw) for dh in (-1, 0, 1) for dw in (-1, 0, 1)]  # k = (dh+1)*3 + (dw+1)

    def kernel(x_ref, w1_ref, w2_ref, o_ref):
        # x_ref : (N, C, HW) f32 VMEM
        # w*_ref: (9, C, C)  f32 VMEM, w[k, co, ci] = torch_w[co, ci, kh, kw], k = kh*3+kw
        # o_ref : (N, C, HW) f32 VMEM

        # Boundary masks for the 9 shifted taps (shared by both convs).  The flat lane
        # index p = h*W + w; shifts wrap cyclically, so any wrapped position is exactly
        # a position that the zero-padding mask kills anyway.
        pos = lax.broadcasted_iota(jnp.int32, (1, 1, HW), 2)
        row = jnp.right_shift(pos, log2_w)        # p // W   (power-of-two W)
        col = jnp.bitwise_and(pos, W - 1)         # p %  W

        def tap_mask(dh, dw):
            conds = []
            if dh == -1:
                conds.append(row >= 1)
            elif dh == 1:
                conds.append(row <= H - 2)
            if dw == -1:
                conds.append(col >= 1)
            elif dw == 1:
                conds.append(col <= W - 2)
            if not conds:
                return None
            m = conds[0]
            for c in conds[1:]:
                m = jnp.logical_and(m, c)
            return m

        masks = {o: tap_mask(*o) for o in offs}

        def conv3x3(src, w_ref):
            # 3x3 'same' conv (no bias) on (N, C, HW): per-tap masked lane-rotation,
            # channel mix as (C_out, C_in) @ (C_in, HW) MXU dots accumulated in f32.
            acc = [jnp.zeros((C, HW), jnp.float32) for _ in range(N)]
            for k, (dh, dw) in enumerate(offs):
                shift = dh * W + dw                               # tap[p] = src[p + shift]
                t = src if shift == 0 else pltpu.roll(src, (-shift) % HW, 2)
                m = masks[(dh, dw)]
                if m is not None:
                    t = jnp.where(m, t, 0.0)                      # zero the out-of-image halo
                wk = w_ref[k]                                     # (C_out, C_in)
                for n in range(N):
                    acc[n] = acc[n] + jnp.dot(
                        wk, t[n], preferred_element_type=jnp.float32)
            return jnp.stack(acc, axis=0)                         # (N, C, HW)

        def inst_norm(y):
            # Centered (two-pass) InstanceNorm over HW, all N*C planes at once.
            mu = jnp.mean(y, axis=2, keepdims=True)               # (N, C, 1)
            yc = y - mu
            var = jnp.mean(yc * yc, axis=2, keepdims=True)        # biased variance
            return yc * lax.rsqrt(var + EPS)

        x = x_ref[...]                                            # (N, C, HW)
        h1 = jnp.maximum(inst_norm(conv3x3(x, w1_ref)), 0.0)      # conv -> IN -> ReLU
        y2 = inst_norm(conv3x3(h1, w2_ref))                       # conv -> IN
        o_ref[...] = (y2 + x).astype(o_ref.dtype)                 # + residual, one dense store

    return kernel


@jax.jit
def resblock_forward(x, w1_oihw, b1, w2_oihw, b2):
    """x: (N, C, H, W) f32; weights in PyTorch OIHW layout.  Returns (N, C, H, W).

    b1/b2 are accepted for interface parity with nn.Conv2d but are not sent to the
    kernel: a per-channel bias added right before an affine-free InstanceNorm is removed
    exactly by the per-(sample, channel) mean subtraction, so it cannot change the output.
    """
    del b1, b2
    N, C, H, W = x.shape
    HW = H * W

    x_flat = x.reshape(N, C, HW)                                  # lane-dense minor dim
    # (9, C_out, C_in) per-tap weight tiles, k = kh*3 + kw.
    w1_taps = jnp.transpose(w1_oihw, (2, 3, 0, 1)).reshape(9, C, C)
    w2_taps = jnp.transpose(w2_oihw, (2, 3, 0, 1)).reshape(9, C, C)

    cost = pl.CostEstimate(
        flops=2 * (2 * N * C * C * 9 * HW),                       # two 3x3 convs
        transcendentals=2 * N * C,                                # one rsqrt per plane per IN
        bytes_accessed=4 * (2 * N * C * HW + 2 * 9 * C * C),
    )

    out_flat = pl.pallas_call(
        _make_resblock_kernel(N, C, H, W),
        out_shape=jax.ShapeDtypeStruct((N, C, HW), x.dtype),
        grid_spec=pltpu.PrefetchScalarGridSpec(
            num_scalar_prefetch=0,
            grid=(1,),                                            # whole problem in one step
            in_specs=[
                pl.BlockSpec((N, C, HW), lambda i: (0, 0, 0)),
                pl.BlockSpec((9, C, C), lambda i: (0, 0, 0)),
                pl.BlockSpec((9, C, C), lambda i: (0, 0, 0)),
            ],
            out_specs=pl.BlockSpec((N, C, HW), lambda i: (0, 0, 0)),
        ),
        compiler_params=pltpu.CompilerParams(dimension_semantics=("arbitrary",)),
        cost_estimate=cost,
    )(x_flat, w1_taps, w2_taps)
    return out_flat.reshape(N, C, H, W)


# ------------------------- plain-JAX reference -------------------------
def _instance_norm(x, eps=EPS):
    mu = jnp.mean(x, axis=(2, 3), keepdims=True)
    var = jnp.mean((x - mu) ** 2, axis=(2, 3), keepdims=True)
    return (x - mu) / jnp.sqrt(var + eps)


def resblock_reference(x, w1, b1, w2, b2):
    dn = ("NCHW", "OIHW", "NCHW")
    y = lax.conv_general_dilated(x, w1, (1, 1), [(1, 1), (1, 1)],
                                 dimension_numbers=dn, precision=lax.Precision.HIGHEST)
    y = y + b1[None, :, None, None]
    y = jnp.maximum(_instance_norm(y), 0.0)
    y = lax.conv_general_dilated(y, w2, (1, 1), [(1, 1), (1, 1)],
                                 dimension_numbers=dn, precision=lax.Precision.HIGHEST)
    y = y + b2[None, :, None, None]
    y = _instance_norm(y)
    return y + x


if __name__ == "__main__":
    key = jax.random.PRNGKey(0)
    k_x, k_w1, k_b1, k_w2, k_b2 = jax.random.split(key, 5)
    N, C, H, W = 2, 4, 16, 16  # ResBlock(dim=4, nz=0)

    x = jax.random.normal(k_x, (N, C, H, W), jnp.float32)
    # Deterministic, PyTorch-Conv2d-style uniform init (fan_in = C * 3 * 3).
    bound = 1.0 / float((C * 9) ** 0.5)
    w1 = jax.random.uniform(k_w1, (C, C, 3, 3), jnp.float32, -bound, bound)
    b1 = jax.random.uniform(k_b1, (C,), jnp.float32, -bound, bound)
    w2 = jax.random.uniform(k_w2, (C, C, 3, 3), jnp.float32, -bound, bound)
    b2 = jax.random.uniform(k_b2, (C,), jnp.float32, -bound, bound)

    out = jax.block_until_ready(resblock_forward(x, w1, b1, w2, b2))
    ref = jax.block_until_ready(resblock_reference(x, w1, b1, w2, b2))

    assert out.shape == (N, C, H, W)
    max_err = float(jnp.max(jnp.abs(out - ref)))
    # Tolerance covers MXU-vs-XLA f32 matmul pass-strategy differences; a layout /
    # shift / mask bug would show up as O(1) error on these unit-variance outputs.
    if max_err > 2e-2:
        raise AssertionError(f"Pallas kernel mismatch vs reference: max |err| = {max_err}")
    print("KERNEL_OK")
</pallas_src>

<mosaic_0001>
module attributes {stable_mosaic.version = 11 : i64} {
  func.func @kernel(%arg0: i32, %arg1: memref<2x4x256xf32, #tpu.memory_space<vmem>>, %arg2: memref<9x4x4xf32, #tpu.memory_space<vmem>>, %arg3: memref<9x4x4xf32, #tpu.memory_space<vmem>>, %arg4: memref<2x4x256xf32, #tpu.memory_space<vmem>>) attributes {dimension_semantics = [#tpu.dimension_semantics<arbitrary>], iteration_bounds = array<i64: 1>, scalar_prefetch = 0 : i64, scratch_operands = 0 : i64, tpu.core_type = #tpu.core_type<tc>, window_params = [{pipeline_mode = #tpu.pipeline_mode<synchronous>, transform_indices = @transform_0, window_bounds = array<i64: 2, 4, 256>}, {pipeline_mode = #tpu.pipeline_mode<synchronous>, transform_indices = @transform_1, window_bounds = array<i64: 9, 4, 4>}, {pipeline_mode = #tpu.pipeline_mode<synchronous>, transform_indices = @transform_2, window_bounds = array<i64: 9, 4, 4>}, {pipeline_mode = #tpu.pipeline_mode<synchronous>, transform_indices = @transform_3, window_bounds = array<i64: 2, 4, 256>}]} {
    %0 = tpu.iota {dimensions = array<i32: 2>} : vector<1x1x256xi32>
    %c4_i32 = arith.constant 4 : i32
    %1 = vector.broadcast %c4_i32 : i32 to vector<1x1x256xi32>
    %2 = arith.shrsi %0, %1 : vector<1x1x256xi32>
    %c15_i32 = arith.constant 15 : i32
    %3 = vector.broadcast %c15_i32 : i32 to vector<1x1x256xi32>
    %4 = arith.andi %0, %3 : vector<1x1x256xi32>
    %c1_i32 = arith.constant 1 : i32
    %5 = vector.broadcast %c1_i32 : i32 to vector<1x1x256xi32>
    %6 = arith.cmpi sge, %2, %5 : vector<1x1x256xi32>
    %c1_i32_0 = arith.constant 1 : i32
    %7 = vector.broadcast %c1_i32_0 : i32 to vector<1x1x256xi32>
    %8 = arith.cmpi sge, %4, %7 : vector<1x1x256xi32>
    %9 = arith.andi %6, %8 : vector<1x1x256xi1>
    %c1_i32_1 = arith.constant 1 : i32
    %10 = vector.broadcast %c1_i32_1 : i32 to vector<1x1x256xi32>
    %11 = arith.cmpi sge, %2, %10 : vector<1x1x256xi32>
    %c1_i32_2 = arith.constant 1 : i32
    %12 = vector.broadcast %c1_i32_2 : i32 to vector<1x1x256xi32>
    %13 = arith.cmpi sge, %2, %12 : vector<1x1x256xi32>
    %c14_i32 = arith.constant 14 : i32
    %14 = vector.broadcast %c14_i32 : i32 to vector<1x1x256xi32>
    %15 = arith.cmpi sle, %4, %14 : vector<1x1x256xi32>
    %16 = arith.andi %13, %15 : vector<1x1x256xi1>
    %c1_i32_3 = arith.constant 1 : i32
    %17 = vector.broadcast %c1_i32_3 : i32 to vector<1x1x256xi32>
    %18 = arith.cmpi sge, %4, %17 : vector<1x1x256xi32>
    %c14_i32_4 = arith.constant 14 : i32
    %19 = vector.broadcast %c14_i32_4 : i32 to vector<1x1x256xi32>
    %20 = arith.cmpi sle, %4, %19 : vector<1x1x256xi32>
    %c14_i32_5 = arith.constant 14 : i32
    %21 = vector.broadcast %c14_i32_5 : i32 to vector<1x1x256xi32>
    %22 = arith.cmpi sle, %2, %21 : vector<1x1x256xi32>
    %c1_i32_6 = arith.constant 1 : i32
    %23 = vector.broadcast %c1_i32_6 : i32 to vector<1x1x256xi32>
    %24 = arith.cmpi sge, %4, %23 : vector<1x1x256xi32>
    %25 = arith.andi %22, %24 : vector<1x1x256xi1>
    %c14_i32_7 = arith.constant 14 : i32
    %26 = vector.broadcast %c14_i32_7 : i32 to vector<1x1x256xi32>
    %27 = arith.cmpi sle, %2, %26 : vector<1x1x256xi32>
    %c14_i32_8 = arith.constant 14 : i32
    %28 = vector.broadcast %c14_i32_8 : i32 to vector<1x1x256xi32>
    %29 = arith.cmpi sle, %2, %28 : vector<1x1x256xi32>
    %c14_i32_9 = arith.constant 14 : i32
    %30 = vector.broadcast %c14_i32_9 : i32 to vector<1x1x256xi32>
    %31 = arith.cmpi sle, %4, %30 : vector<1x1x256xi32>
    %32 = arith.andi %29, %31 : vector<1x1x256xi1>
    %c0 = arith.constant 0 : index
    %c0_10 = arith.constant 0 : index
    %c0_11 = arith.constant 0 : index
    %33 = vector.load %arg1[%c0, %c0_10, %c0_11] : memref<2x4x256xf32, #tpu.memory_space<vmem>>, vector<2x4x256xf32>
    %cst = arith.constant 0.000000e+00 : f32
    %34 = vector.broadcast %cst : f32 to vector<4x256xf32>
    %cst_12 = arith.constant 0.000000e+00 : f32
    %35 = vector.broadcast %cst_12 : f32 to vector<4x256xf32>
    %c17_i32 = arith.constant 17 : i32
    %36 = tpu.dynamic_rotate %33 by %c17_i32 dim 2 : vector<2x4x256xf32>, i32 -> vector<2x4x256xf32>
    %cst_13 = arith.constant 0.000000e+00 : f32
    %37 = vector.shape_cast %9 : vector<1x1x256xi1> to vector<1x1x256xi1>
    %38 = vector.broadcast %37 : vector<1x1x256xi1> to vector<2x4x256xi1>
    %39 = vector.broadcast %cst_13 : f32 to vector<2x4x256xf32>
    %40 = arith.select %38, %36, %39 : vector<2x4x256xi1>, vector<2x4x256xf32>
    %c0_14 = arith.constant 0 : index
    %c0_15 = arith.constant 0 : index
    %c0_16 = arith.constant 0 : index
    %41 = vector.load %arg2[%c0_14, %c0_15, %c0_16] : memref<9x4x4xf32, #tpu.memory_space<vmem>>, vector<1x4x4xf32>
    %42 = vector.shape_cast %41 : vector<1x4x4xf32> to vector<4x4xf32>
    %43 = vector.extract_strided_slice %40 {offsets = [0, 0, 0], sizes = [1, 4, 256], strides = [1, 1, 1]} : vector<2x4x256xf32> to vector<1x4x256xf32>
    %44 = vector.shape_cast %43 : vector<1x4x256xf32> to vector<4x256xf32>
    %cst_17 = arith.constant dense<0.000000e+00> : vector<4x256xf32>
    %45 = tpu.matmul %42, %44, %cst_17 {dimension_numbers = #tpu.dot_dimension_numbers<[1], [0], [0], [1], [0, 0, 1, 1], [], []>} : vector<4x4xf32>, vector<4x256xf32>, vector<4x256xf32> -> vector<4x256xf32>
    %46 = arith.addf %34, %45 : vector<4x256xf32>
    %47 = vector.extract_strided_slice %40 {offsets = [1, 0, 0], sizes = [1, 4, 256], strides = [1, 1, 1]} : vector<2x4x256xf32> to vector<1x4x256xf32>
    %48 = vector.shape_cast %47 : vector<1x4x256xf32> to vector<4x256xf32>
    %cst_18 = arith.constant dense<0.000000e+00> : vector<4x256xf32>
    %49 = tpu.matmul %42, %48, %cst_18 {dimension_numbers = #tpu.dot_dimension_numbers<[1], [0], [0], [1], [0, 0, 1, 1], [], []>} : vector<4x4xf32>, vector<4x256xf32>, vector<4x256xf32> -> vector<4x256xf32>
    %50 = arith.addf %35, %49 : vector<4x256xf32>
    %c16_i32 = arith.constant 16 : i32
    %51 = tpu.dynamic_rotate %33 by %c16_i32 dim 2 : vector<2x4x256xf32>, i32 -> vector<2x4x256xf32>
    %cst_19 = arith.constant 0.000000e+00 : f32
    %52 = vector.shape_cast %11 : vector<1x1x256xi1> to vector<1x1x256xi1>
    %53 = vector.broadcast %52 : vector<1x1x256xi1> to vector<2x4x256xi1>
    %54 = vector.broadcast %cst_19 : f32 to vector<2x4x256xf32>
    %55 = arith.select %53, %51, %54 : vector<2x4x256xi1>, vector<2x4x256xf32>
    %c1 = arith.constant 1 : index
    %c0_20 = arith.constant 0 : index
    %c0_21 = arith.constant 0 : index
    %56 = vector.load %arg2[%c1, %c0_20, %c0_21] : memref<9x4x4xf32, #tpu.memory_space<vmem>>, vector<1x4x4xf32>
    %57 = vector.shape_cast %56 : vector<1x4x4xf32> to vector<4x4xf32>
    %58 = vector.extract_strided_slice %55 {offsets = [0, 0, 0], sizes = [1, 4, 256], strides = [1, 1, 1]} : vector<2x4x256xf32> to vector<1x4x256xf32>
    %59 = vector.shape_cast %58 : vector<1x4x256xf32> to vector<4x256xf32>
    %cst_22 = arith.constant dense<0.000000e+00> : vector<4x256xf32>
    %60 = tpu.matmul %57, %59, %cst_22 {dimension_numbers = #tpu.dot_dimension_numbers<[1], [0], [0], [1], [0, 0, 1, 1], [], []>} : vector<4x4xf32>, vector<4x256xf32>, vector<4x256xf32> -> vector<4x256xf32>
    %61 = arith.addf %46, %60 : vector<4x256xf32>
    %62 = vector.extract_strided_slice %55 {offsets = [1, 0, 0], sizes = [1, 4, 256], strides = [1, 1, 1]} : vector<2x4x256xf32> to vector<1x4x256xf32>
    %63 = vector.shape_cast %62 : vector<1x4x256xf32> to vector<4x256xf32>
    %cst_23 = arith.constant dense<0.000000e+00> : vector<4x256xf32>
    %64 = tpu.matmul %57, %63, %cst_23 {dimension_numbers = #tpu.dot_dimension_numbers<[1], [0], [0], [1], [0, 0, 1, 1], [], []>} : vector<4x4xf32>, vector<4x256xf32>, vector<4x256xf32> -> vector<4x256xf32>
    %65 = arith.addf %50, %64 : vector<4x256xf32>
    %c15_i32_24 = arith.constant 15 : i32
    %66 = tpu.dynamic_rotate %33 by %c15_i32_24 dim 2 : vector<2x4x256xf32>, i32 -> vector<2x4x256xf32>
    %cst_25 = arith.constant 0.000000e+00 : f32
    %67 = vector.shape_cast %16 : vector<1x1x256xi1> to vector<1x1x256xi1>
    %68 = vector.broadcast %67 : vector<1x1x256xi1> to vector<2x4x256xi1>
    %69 = vector.broadcast %cst_25 : f32 to vector<2x4x256xf32>
    %70 = arith.select %68, %66, %69 : vector<2x4x256xi1>, vector<2x4x256xf32>
    %c2 = arith.constant 2 : index
    %c0_26 = arith.constant 0 : index
    %c0_27 = arith.constant 0 : index
    %71 = vector.load %arg2[%c2, %c0_26, %c0_27] : memref<9x4x4xf32, #tpu.memory_space<vmem>>, vector<1x4x4xf32>
    %72 = vector.shape_cast %71 : vector<1x4x4xf32> to vector<4x4xf32>
    %73 = vector.extract_strided_slice %70 {offsets = [0, 0, 0], sizes = [1, 4, 256], strides = [1, 1, 1]} : vector<2x4x256xf32> to vector<1x4x256xf32>
    %74 = vector.shape_cast %73 : vector<1x4x256xf32> to vector<4x256xf32>
    %cst_28 = arith.constant dense<0.000000e+00> : vector<4x256xf32>
    %75 = tpu.matmul %72, %74, %cst_28 {dimension_numbers = #tpu.dot_dimension_numbers<[1], [0], [0], [1], [0, 0, 1, 1], [], []>} : vector<4x4xf32>, vector<4x256xf32>, vector<4x256xf32> -> vector<4x256xf32>
    %76 = arith.addf %61, %75 : vector<4x256xf32>
    %77 = vector.extract_strided_slice %70 {offsets = [1, 0, 0], sizes = [1, 4, 256], strides = [1, 1, 1]} : vector<2x4x256xf32> to vector<1x4x256xf32>
    %78 = vector.shape_cast %77 : vector<1x4x256xf32> to vector<4x256xf32>
    %cst_29 = arith.constant dense<0.000000e+00> : vector<4x256xf32>
    %79 = tpu.matmul %72, %78, %cst_29 {dimension_numbers = #tpu.dot_dimension_numbers<[1], [0], [0], [1], [0, 0, 1, 1], [], []>} : vector<4x4xf32>, vector<4x256xf32>, vector<4x256xf32> -> vector<4x256xf32>
    %80 = arith.addf %65, %79 : vector<4x256xf32>
    %c1_i32_30 = arith.constant 1 : i32
    %81 = tpu.dynamic_rotate %33 by %c1_i32_30 dim 2 : vector<2x4x256xf32>, i32 -> vector<2x4x256xf32>
    %cst_31 = arith.constant 0.000000e+00 : f32
    %82 = vector.shape_cast %18 : vector<1x1x256xi1> to vector<1x1x256xi1>
    %83 = vector.broadcast %82 : vector<1x1x256xi1> to vector<2x4x256xi1>
    %84 = vector.broadcast %cst_31 : f32 to vector<2x4x256xf32>
    %85 = arith.select %83, %81, %84 : vector<2x4x256xi1>, vector<2x4x256xf32>
    %c3 = arith.constant 3 : index
    %c0_32 = arith.constant 0 : index
    %c0_33 = arith.constant 0 : index
    %86 = vector.load %arg2[%c3, %c0_32, %c0_33] : memref<9x4x4xf32, #tpu.memory_space<vmem>>, vector<1x4x4xf32>
    %87 = vector.shape_cast %86 : vector<1x4x4xf32> to vector<4x4xf32>
    %88 = vector.extract_strided_slice %85 {offsets = [0, 0, 0], sizes = [1, 4, 256], strides = [1, 1, 1]} : vector<2x4x256xf32> to vector<1x4x256xf32>
    %89 = vector.shape_cast %88 : vector<1x4x256xf32> to vector<4x256xf32>
    %cst_34 = arith.constant dense<0.000000e+00> : vector<4x256xf32>
    %90 = tpu.matmul %87, %89, %cst_34 {dimension_numbers = #tpu.dot_dimension_numbers<[1], [0], [0], [1], [0, 0, 1, 1], [], []>} : vector<4x4xf32>, vector<4x256xf32>, vector<4x256xf32> -> vector<4x256xf32>
    %91 = arith.addf %76, %90 : vector<4x256xf32>
    %92 = vector.extract_strided_slice %85 {offsets = [1, 0, 0], sizes = [1, 4, 256], strides = [1, 1, 1]} : vector<2x4x256xf32> to vector<1x4x256xf32>
    %93 = vector.shape_cast %92 : vector<1x4x256xf32> to vector<4x256xf32>
    %cst_35 = arith.constant dense<0.000000e+00> : vector<4x256xf32>
    %94 = tpu.matmul %87, %93, %cst_35 {dimension_numbers = #tpu.dot_dimension_numbers<[1], [0], [0], [1], [0, 0, 1, 1], [], []>} : vector<4x4xf32>, vector<4x256xf32>, vector<4x256xf32> -> vector<4x256xf32>
    %95 = arith.addf %80, %94 : vector<4x256xf32>
    %c4 = arith.constant 4 : index
    %c0_36 = arith.constant 0 : index
    %c0_37 = arith.constant 0 : index
    %96 = vector.load %arg2[%c4, %c0_36, %c0_37] : memref<9x4x4xf32, #tpu.memory_space<vmem>>, vector<1x4x4xf32>
    %97 = vector.shape_cast %96 : vector<1x4x4xf32> to vector<4x4xf32>
    %98 = vector.extract_strided_slice %33 {offsets = [0, 0, 0], sizes = [1, 4, 256], strides = [1, 1, 1]} : vector<2x4x256xf32> to vector<1x4x256xf32>
    %99 = vector.shape_cast %98 : vector<1x4x256xf32> to vector<4x256xf32>
    %cst_38 = arith.constant dense<0.000000e+00> : vector<4x256xf32>
    %100 = tpu.matmul %97, %99, %cst_38 {dimension_numbers = #tpu.dot_dimension_numbers<[1], [0], [0], [1], [0, 0, 1, 1], [], []>} : vector<4x4xf32>, vector<4x256xf32>, vector<4x256xf32> -> vector<4x256xf32>
    %101 = arith.addf %91, %100 : vector<4x256xf32>
    %102 = vector.extract_strided_slice %33 {offsets = [1, 0, 0], sizes = [1, 4, 256], strides = [1, 1, 1]} : vector<2x4x256xf32> to vector<1x4x256xf32>
    %103 = vector.shape_cast %102 : vector<1x4x256xf32> to vector<4x256xf32>
    %cst_39 = arith.constant dense<0.000000e+00> : vector<4x256xf32>
    %104 = tpu.matmul %97, %103, %cst_39 {dimension_numbers = #tpu.dot_dimension_numbers<[1], [0], [0], [1], [0, 0, 1, 1], [], []>} : vector<4x4xf32>, vector<4x256xf32>, vector<4x256xf32> -> vector<4x256xf32>
    %105 = arith.addf %95, %104 : vector<4x256xf32>
    %c255_i32 = arith.constant 255 : i32
    %106 = tpu.dynamic_rotate %33 by %c255_i32 dim 2 : vector<2x4x256xf32>, i32 -> vector<2x4x256xf32>
    %cst_40 = arith.constant 0.000000e+00 : f32
    %107 = vector.shape_cast %20 : vector<1x1x256xi1> to vector<1x1x256xi1>
    %108 = vector.broadcast %107 : vector<1x1x256xi1> to vector<2x4x256xi1>
    %109 = vector.broadcast %cst_40 : f32 to vector<2x4x256xf32>
    %110 = arith.select %108, %106, %109 : vector<2x4x256xi1>, vector<2x4x256xf32>
    %c5 = arith.constant 5 : index
    %c0_41 = arith.constant 0 : index
    %c0_42 = arith.constant 0 : index
    %111 = vector.load %arg2[%c5, %c0_41, %c0_42] : memref<9x4x4xf32, #tpu.memory_space<vmem>>, vector<1x4x4xf32>
    %112 = vector.shape_cast %111 : vector<1x4x4xf32> to vector<4x4xf32>
    %113 = vector.extract_strided_slice %110 {offsets = [0, 0, 0], sizes = [1, 4, 256], strides = [1, 1, 1]} : vector<2x4x256xf32> to vector<1x4x256xf32>
    %114 = vector.shape_cast %113 : vector<1x4x256xf32> to vector<4x256xf32>
    %cst_43 = arith.constant dense<0.000000e+00> : vector<4x256xf32>
    %115 = tpu.matmul %112, %114, %cst_43 {dimension_numbers = #tpu.dot_dimension_numbers<[1], [0], [0], [1], [0, 0, 1, 1], [], []>} : vector<4x4xf32>, vector<4x256xf32>, vector<4x256xf32> -> vector<4x256xf32>
    %116 = arith.addf %101, %115 : vector<4x256xf32>
    %117 = vector.extract_strided_slice %110 {offsets = [1, 0, 0], sizes = [1, 4, 256], strides = [1, 1, 1]} : vector<2x4x256xf32> to vector<1x4x256xf32>
    %118 = vector.shape_cast %117 : vector<1x4x256xf32> to vector<4x256xf32>
    %cst_44 = arith.constant dense<0.000000e+00> : vector<4x256xf32>
    %119 = tpu.matmul %112, %118, %cst_44 {dimension_numbers = #tpu.dot_dimension_numbers<[1], [0], [0], [1], [0, 0, 1, 1], [], []>} : vector<4x4xf32>, vector<4x256xf32>, vector<4x256xf32> -> vector<4x256xf32>
    %120 = arith.addf %105, %119 : vector<4x256xf32>
    %c241_i32 = arith.constant 241 : i32
    %121 = tpu.dynamic_rotate %33 by %c241_i32 dim 2 : vector<2x4x256xf32>, i32 -> vector<2x4x256xf32>
    %cst_45 = arith.constant 0.000000e+00 : f32
    %122 = vector.shape_cast %25 : vector<1x1x256xi1> to vector<1x1x256xi1>
    %123 = vector.broadcast %122 : vector<1x1x256xi1> to vector<2x4x256xi1>
    %124 = vector.broadcast %cst_45 : f32 to vector<2x4x256xf32>
    %125 = arith.select %123, %121, %124 : vector<2x4x256xi1>, vector<2x4x256xf32>
    %c6 = arith.constant 6 : index
    %c0_46 = arith.constant 0 : index
    %c0_47 = arith.constant 0 : index
    %126 = vector.load %arg2[%c6, %c0_46, %c0_47] : memref<9x4x4xf32, #tpu.memory_space<vmem>>, vector<1x4x4xf32>
    %127 = vector.shape_cast %126 : vector<1x4x4xf32> to vector<4x4xf32>
    %128 = vector.extract_strided_slice %125 {offsets = [0, 0, 0], sizes = [1, 4, 256], strides = [1, 1, 1]} : vector<2x4x256xf32> to vector<1x4x256xf32>
    %129 = vector.shape_cast %128 : vector<1x4x256xf32> to vector<4x256xf32>
    %cst_48 = arith.constant dense<0.000000e+00> : vector<4x256xf32>
    %130 = tpu.matmul %127, %129, %cst_48 {dimension_numbers = #tpu.dot_dimension_numbers<[1], [0], [0], [1], [0, 0, 1, 1], [], []>} : vector<4x4xf32>, vector<4x256xf32>, vector<4x256xf32> -> vector<4x256xf32>
    %131 = arith.addf %116, %130 : vector<4x256xf32>
    %132 = vector.extract_strided_slice %125 {offsets = [1, 0, 0], sizes = [1, 4, 256], strides = [1, 1, 1]} : vector<2x4x256xf32> to vector<1x4x256xf32>
    %133 = vector.shape_cast %132 : vector<1x4x256xf32> to vector<4x256xf32>
    %cst_49 = arith.constant dense<0.000000e+00> : vector<4x256xf32>
    %134 = tpu.matmul %127, %133, %cst_49 {dimension_numbers = #tpu.dot_dimension_numbers<[1], [0], [0], [1], [0, 0, 1, 1], [], []>} : vector<4x4xf32>, vector<4x256xf32>, vector<4x256xf32> -> vector<4x256xf32>
    %135 = arith.addf %120, %134 : vector<4x256xf32>
    %c240_i32 = arith.constant 240 : i32
    %136 = tpu.dynamic_rotate %33 by %c240_i32 dim 2 : vector<2x4x256xf32>, i32 -> vector<2x4x256xf32>
    %cst_50 = arith.constant 0.000000e+00 : f32
    %137 = vector.shape_cast %27 : vector<1x1x256xi1> to vector<1x1x256xi1>
    %138 = vector.broadcast %137 : vector<1x1x256xi1> to vector<2x4x256xi1>
    %139 = vector.broadcast %cst_50 : f32 to vector<2x4x256xf32>
    %140 = arith.select %138, %136, %139 : vector<2x4x256xi1>, vector<2x4x256xf32>
    %c7 = arith.constant 7 : index
    %c0_51 = arith.constant 0 : index
    %c0_52 = arith.constant 0 : index
    %141 = vector.load %arg2[%c7, %c0_51, %c0_52] : memref<9x4x4xf32, #tpu.memory_space<vmem>>, vector<1x4x4xf32>
    %142 = vector.shape_cast %141 : vector<1x4x4xf32> to vector<4x4xf32>
    %143 = vector.extract_strided_slice %140 {offsets = [0, 0, 0], sizes = [1, 4, 256], strides = [1, 1, 1]} : vector<2x4x256xf32> to vector<1x4x256xf32>
    %144 = vector.shape_cast %143 : vector<1x4x256xf32> to vector<4x256xf32>
    %cst_53 = arith.constant dense<0.000000e+00> : vector<4x256xf32>
    %145 = tpu.matmul %142, %144, %cst_53 {dimension_numbers = #tpu.dot_dimension_numbers<[1], [0], [0], [1], [0, 0, 1, 1], [], []>} : vector<4x4xf32>, vector<4x256xf32>, vector<4x256xf32> -> vector<4x256xf32>
    %146 = arith.addf %131, %145 : vector<4x256xf32>
    %147 = vector.extract_strided_slice %140 {offsets = [1, 0, 0], sizes = [1, 4, 256], strides = [1, 1, 1]} : vector<2x4x256xf32> to vector<1x4x256xf32>
    %148 = vector.shape_cast %147 : vector<1x4x256xf32> to vector<4x256xf32>
    %cst_54 = arith.constant dense<0.000000e+00> : vector<4x256xf32>
    %149 = tpu.matmul %142, %148, %cst_54 {dimension_numbers = #tpu.dot_dimension_numbers<[1], [0], [0], [1], [0, 0, 1, 1], [], []>} : vector<4x4xf32>, vector<4x256xf32>, vector<4x256xf32> -> vector<4x256xf32>
    %150 = arith.addf %135, %149 : vector<4x256xf32>
    %c239_i32 = arith.constant 239 : i32
    %151 = tpu.dynamic_rotate %33 by %c239_i32 dim 2 : vector<2x4x256xf32>, i32 -> vector<2x4x256xf32>
    %cst_55 = arith.constant 0.000000e+00 : f32
    %152 = vector.shape_cast %32 : vector<1x1x256xi1> to vector<1x1x256xi1>
    %153 = vector.broadcast %152 : vector<1x1x256xi1> to vector<2x4x256xi1>
    %154 = vector.broadcast %cst_55 : f32 to vector<2x4x256xf32>
    %155 = arith.select %153, %151, %154 : vector<2x4x256xi1>, vector<2x4x256xf32>
    %c8 = arith.constant 8 : index
    %c0_56 = arith.constant 0 : index
    %c0_57 = arith.constant 0 : index
    %156 = vector.load %arg2[%c8, %c0_56, %c0_57] : memref<9x4x4xf32, #tpu.memory_space<vmem>>, vector<1x4x4xf32>
    %157 = vector.shape_cast %156 : vector<1x4x4xf32> to vector<4x4xf32>
    %158 = vector.extract_strided_slice %155 {offsets = [0, 0, 0], sizes = [1, 4, 256], strides = [1, 1, 1]} : vector<2x4x256xf32> to vector<1x4x256xf32>
    %159 = vector.shape_cast %158 : vector<1x4x256xf32> to vector<4x256xf32>
    %cst_58 = arith.constant dense<0.000000e+00> : vector<4x256xf32>
    %160 = tpu.matmul %157, %159, %cst_58 {dimension_numbers = #tpu.dot_dimension_numbers<[1], [0], [0], [1], [0, 0, 1, 1], [], []>} : vector<4x4xf32>, vector<4x256xf32>, vector<4x256xf32> -> vector<4x256xf32>
    %161 = arith.addf %146, %160 : vector<4x256xf32>
    %162 = vector.extract_strided_slice %155 {offsets = [1, 0, 0], sizes = [1, 4, 256], strides = [1, 1, 1]} : vector<2x4x256xf32> to vector<1x4x256xf32>
    %163 = vector.shape_cast %162 : vector<1x4x256xf32> to vector<4x256xf32>
    %cst_59 = arith.constant dense<0.000000e+00> : vector<4x256xf32>
    %164 = tpu.matmul %157, %163, %cst_59 {dimension_numbers = #tpu.dot_dimension_numbers<[1], [0], [0], [1], [0, 0, 1, 1], [], []>} : vector<4x4xf32>, vector<4x256xf32>, vector<4x256xf32> -> vector<4x256xf32>
    %165 = arith.addf %150, %164 : vector<4x256xf32>
    %166 = vector.shape_cast %161 : vector<4x256xf32> to vector<1x4x256xf32>
    %167 = vector.shape_cast %165 : vector<4x256xf32> to vector<1x4x256xf32>
    %168 = tpu.concatenate %166, %167 in 0 : vector<1x4x256xf32>, vector<1x4x256xf32> -> vector<2x4x256xf32>
    %cst_60 = arith.constant dense<0.000000e+00> : vector<2x4xf32>
    %169 = vector.multi_reduction <add>, %168, %cst_60 [2] : vector<2x4x256xf32> to vector<2x4xf32>
    %170 = vector.shape_cast %169 : vector<2x4xf32> to vector<2x4x1xf32>
    %cst_61 = arith.constant 2.560000e+02 : f32
    %171 = vector.broadcast %cst_61 : f32 to vector<2x4x1xf32>
    %172 = arith.divf %170, %171 : vector<2x4x1xf32>
    %173 = vector.broadcast %172 : vector<2x4x1xf32> to vector<2x4x256xf32>
    %174 = arith.subf %168, %173 : vector<2x4x256xf32>
    %175 = arith.mulf %174, %174 : vector<2x4x256xf32>
    %cst_62 = arith.constant dense<0.000000e+00> : vector<2x4xf32>
    %176 = vector.multi_reduction <add>, %175, %cst_62 [2] : vector<2x4x256xf32> to vector<2x4xf32>
    %177 = vector.shape_cast %176 : vector<2x4xf32> to vector<2x4x1xf32>
    %cst_63 = arith.constant 2.560000e+02 : f32
    %178 = vector.broadcast %cst_63 : f32 to vector<2x4x1xf32>
    %179 = arith.divf %177, %178 : vector<2x4x1xf32>
    %cst_64 = arith.constant 9.99999974E-6 : f32
    %180 = vector.broadcast %cst_64 : f32 to vector<2x4x1xf32>
    %181 = arith.addf %179, %180 : vector<2x4x1xf32>
    %182 = math.rsqrt %181 : vector<2x4x1xf32>
    %183 = vector.broadcast %182 : vector<2x4x1xf32> to vector<2x4x256xf32>
    %184 = arith.mulf %174, %183 : vector<2x4x256xf32>
    %cst_65 = arith.constant 0.000000e+00 : f32
    %185 = vector.broadcast %cst_65 : f32 to vector<2x4x256xf32>
    %186 = arith.maximumf %184, %185 : vector<2x4x256xf32>
    %cst_66 = arith.constant 0.000000e+00 : f32
    %187 = vector.broadcast %cst_66 : f32 to vector<4x256xf32>
    %cst_67 = arith.constant 0.000000e+00 : f32
    %188 = vector.broadcast %cst_67 : f32 to vector<4x256xf32>
    %c17_i32_68 = arith.constant 17 : i32
    %189 = tpu.dynamic_rotate %186 by %c17_i32_68 dim 2 : vector<2x4x256xf32>, i32 -> vector<2x4x256xf32>
    %cst_69 = arith.constant 0.000000e+00 : f32
    %190 = vector.shape_cast %9 : vector<1x1x256xi1> to vector<1x1x256xi1>
    %191 = vector.broadcast %190 : vector<1x1x256xi1> to vector<2x4x256xi1>
    %192 = vector.broadcast %cst_69 : f32 to vector<2x4x256xf32>
    %193 = arith.select %191, %189, %192 : vector<2x4x256xi1>, vector<2x4x256xf32>
    %c0_70 = arith.constant 0 : index
    %c0_71 = arith.constant 0 : index
    %c0_72 = arith.constant 0 : index
    %194 = vector.load %arg3[%c0_70, %c0_71, %c0_72] : memref<9x4x4xf32, #tpu.memory_space<vmem>>, vector<1x4x4xf32>
    %195 = vector.shape_cast %194 : vector<1x4x4xf32> to vector<4x4xf32>
    %196 = vector.extract_strided_slice %193 {offsets = [0, 0, 0], sizes = [1, 4, 256], strides = [1, 1, 1]} : vector<2x4x256xf32> to vector<1x4x256xf32>
    %197 = vector.shape_cast %196 : vector<1x4x256xf32> to vector<4x256xf32>
    %cst_73 = arith.constant dense<0.000000e+00> : vector<4x256xf32>
    %198 = tpu.matmul %195, %197, %cst_73 {dimension_numbers = #tpu.dot_dimension_numbers<[1], [0], [0], [1], [0, 0, 1, 1], [], []>} : vector<4x4xf32>, vector<4x256xf32>, vector<4x256xf32> -> vector<4x256xf32>
    %199 = arith.addf %187, %198 : vector<4x256xf32>
    %200 = vector.extract_strided_slice %193 {offsets = [1, 0, 0], sizes = [1, 4, 256], strides = [1, 1, 1]} : vector<2x4x256xf32> to vector<1x4x256xf32>
    %201 = vector.shape_cast %200 : vector<1x4x256xf32> to vector<4x256xf32>
    %cst_74 = arith.constant dense<0.000000e+00> : vector<4x256xf32>
    %202 = tpu.matmul %195, %201, %cst_74 {dimension_numbers = #tpu.dot_dimension_numbers<[1], [0], [0], [1], [0, 0, 1, 1], [], []>} : vector<4x4xf32>, vector<4x256xf32>, vector<4x256xf32> -> vector<4x256xf32>
    %203 = arith.addf %188, %202 : vector<4x256xf32>
    %c16_i32_75 = arith.constant 16 : i32
    %204 = tpu.dynamic_rotate %186 by %c16_i32_75 dim 2 : vector<2x4x256xf32>, i32 -> vector<2x4x256xf32>
    %cst_76 = arith.constant 0.000000e+00 : f32
    %205 = vector.shape_cast %11 : vector<1x1x256xi1> to vector<1x1x256xi1>
    %206 = vector.broadcast %205 : vector<1x1x256xi1> to vector<2x4x256xi1>
    %207 = vector.broadcast %cst_76 : f32 to vector<2x4x256xf32>
    %208 = arith.select %206, %204, %207 : vector<2x4x256xi1>, vector<2x4x256xf32>
    %c1_77 = arith.constant 1 : index
    %c0_78 = arith.constant 0 : index
    %c0_79 = arith.constant 0 : index
    %209 = vector.load %arg3[%c1_77, %c0_78, %c0_79] : memref<9x4x4xf32, #tpu.memory_space<vmem>>, vector<1x4x4xf32>
    %210 = vector.shape_cast %209 : vector<1x4x4xf32> to vector<4x4xf32>
    %211 = vector.extract_strided_slice %208 {offsets = [0, 0, 0], sizes = [1, 4, 256], strides = [1, 1, 1]} : vector<2x4x256xf32> to vector<1x4x256xf32>
    %212 = vector.shape_cast %211 : vector<1x4x256xf32> to vector<4x256xf32>
    %cst_80 = arith.constant dense<0.000000e+00> : vector<4x256xf32>
    %213 = tpu.matmul %210, %212, %cst_80 {dimension_numbers = #tpu.dot_dimension_numbers<[1], [0], [0], [1], [0, 0, 1, 1], [], []>} : vector<4x4xf32>, vector<4x256xf32>, vector<4x256xf32> -> vector<4x256xf32>
    %214 = arith.addf %199, %213 : vector<4x256xf32>
    %215 = vector.extract_strided_slice %208 {offsets = [1, 0, 0], sizes = [1, 4, 256], strides = [1, 1, 1]} : vector<2x4x256xf32> to vector<1x4x256xf32>
    %216 = vector.shape_cast %215 : vector<1x4x256xf32> to vector<4x256xf32>
    %cst_81 = arith.constant dense<0.000000e+00> : vector<4x256xf32>
    %217 = tpu.matmul %210, %216, %cst_81 {dimension_numbers = #tpu.dot_dimension_numbers<[1], [0], [0], [1], [0, 0, 1, 1], [], []>} : vector<4x4xf32>, vector<4x256xf32>, vector<4x256xf32> -> vector<4x256xf32>
    %218 = arith.addf %203, %217 : vector<4x256xf32>
    %c15_i32_82 = arith.constant 15 : i32
    %219 = tpu.dynamic_rotate %186 by %c15_i32_82 dim 2 : vector<2x4x256xf32>, i32 -> vector<2x4x256xf32>
    %cst_83 = arith.constant 0.000000e+00 : f32
    %220 = vector.shape_cast %16 : vector<1x1x256xi1> to vector<1x1x256xi1>
    %221 = vector.broadcast %220 : vector<1x1x256xi1> to vector<2x4x256xi1>
    %222 = vector.broadcast %cst_83 : f32 to vector<2x4x256xf32>
    %223 = arith.select %221, %219, %222 : vector<2x4x256xi1>, vector<2x4x256xf32>
    %c2_84 = arith.constant 2 : index
    %c0_85 = arith.constant 0 : index
    %c0_86 = arith.constant 0 : index
    %224 = vector.load %arg3[%c2_84, %c0_85, %c0_86] : memref<9x4x4xf32, #tpu.memory_space<vmem>>, vector<1x4x4xf32>
    %225 = vector.shape_cast %224 : vector<1x4x4xf32> to vector<4x4xf32>
    %226 = vector.extract_strided_slice %223 {offsets = [0, 0, 0], sizes = [1, 4, 256], strides = [1, 1, 1]} : vector<2x4x256xf32> to vector<1x4x256xf32>
    %227 = vector.shape_cast %226 : vector<1x4x256xf32> to vector<4x256xf32>
    %cst_87 = arith.constant dense<0.000000e+00> : vector<4x256xf32>
    %228 = tpu.matmul %225, %227, %cst_87 {dimension_numbers = #tpu.dot_dimension_numbers<[1], [0], [0], [1], [0, 0, 1, 1], [], []>} : vector<4x4xf32>, vector<4x256xf32>, vector<4x256xf32> -> vector<4x256xf32>
    %229 = arith.addf %214, %228 : vector<4x256xf32>
    %230 = vector.extract_strided_slice %223 {offsets = [1, 0, 0], sizes = [1, 4, 256], strides = [1, 1, 1]} : vector<2x4x256xf32> to vector<1x4x256xf32>
    %231 = vector.shape_cast %230 : vector<1x4x256xf32> to vector<4x256xf32>
    %cst_88 = arith.constant dense<0.000000e+00> : vector<4x256xf32>
    %232 = tpu.matmul %225, %231, %cst_88 {dimension_numbers = #tpu.dot_dimension_numbers<[1], [0], [0], [1], [0, 0, 1, 1], [], []>} : vector<4x4xf32>, vector<4x256xf32>, vector<4x256xf32> -> vector<4x256xf32>
    %233 = arith.addf %218, %232 : vector<4x256xf32>
    %c1_i32_89 = arith.constant 1 : i32
    %234 = tpu.dynamic_rotate %186 by %c1_i32_89 dim 2 : vector<2x4x256xf32>, i32 -> vector<2x4x256xf32>
    %cst_90 = arith.constant 0.000000e+00 : f32
    %235 = vector.shape_cast %18 : vector<1x1x256xi1> to vector<1x1x256xi1>
    %236 = vector.broadcast %235 : vector<1x1x256xi1> to vector<2x4x256xi1>
    %237 = vector.broadcast %cst_90 : f32 to vector<2x4x256xf32>
    %238 = arith.select %236, %234, %237 : vector<2x4x256xi1>, vector<2x4x256xf32>
    %c3_91 = arith.constant 3 : index
    %c0_92 = arith.constant 0 : index
    %c0_93 = arith.constant 0 : index
    %239 = vector.load %arg3[%c3_91, %c0_92, %c0_93] : memref<9x4x4xf32, #tpu.memory_space<vmem>>, vector<1x4x4xf32>
    %240 = vector.shape_cast %239 : vector<1x4x4xf32> to vector<4x4xf32>
    %241 = vector.extract_strided_slice %238 {offsets = [0, 0, 0], sizes = [1, 4, 256], strides = [1, 1, 1]} : vector<2x4x256xf32> to vector<1x4x256xf32>
    %242 = vector.shape_cast %241 : vector<1x4x256xf32> to vector<4x256xf32>
    %cst_94 = arith.constant dense<0.000000e+00> : vector<4x256xf32>
    %243 = tpu.matmul %240, %242, %cst_94 {dimension_numbers = #tpu.dot_dimension_numbers<[1], [0], [0], [1], [0, 0, 1, 1], [], []>} : vector<4x4xf32>, vector<4x256xf32>, vector<4x256xf32> -> vector<4x256xf32>
    %244 = arith.addf %229, %243 : vector<4x256xf32>
    %245 = vector.extract_strided_slice %238 {offsets = [1, 0, 0], sizes = [1, 4, 256], strides = [1, 1, 1]} : vector<2x4x256xf32> to vector<1x4x256xf32>
    %246 = vector.shape_cast %245 : vector<1x4x256xf32> to vector<4x256xf32>
    %cst_95 = arith.constant dense<0.000000e+00> : vector<4x256xf32>
    %247 = tpu.matmul %240, %246, %cst_95 {dimension_numbers = #tpu.dot_dimension_numbers<[1], [0], [0], [1], [0, 0, 1, 1], [], []>} : vector<4x4xf32>, vector<4x256xf32>, vector<4x256xf32> -> vector<4x256xf32>
    %248 = arith.addf %233, %247 : vector<4x256xf32>
    %c4_96 = arith.constant 4 : index
    %c0_97 = arith.constant 0 : index
    %c0_98 = arith.constant 0 : index
    %249 = vector.load %arg3[%c4_96, %c0_97, %c0_98] : memref<9x4x4xf32, #tpu.memory_space<vmem>>, vector<1x4x4xf32>
    %250 = vector.shape_cast %249 : vector<1x4x4xf32> to vector<4x4xf32>
    %251 = vector.extract_strided_slice %186 {offsets = [0, 0, 0], sizes = [1, 4, 256], strides = [1, 1, 1]} : vector<2x4x256xf32> to vector<1x4x256xf32>
    %252 = vector.shape_cast %251 : vector<1x4x256xf32> to vector<4x256xf32>
    %cst_99 = arith.constant dense<0.000000e+00> : vector<4x256xf32>
    %253 = tpu.matmul %250, %252, %cst_99 {dimension_numbers = #tpu.dot_dimension_numbers<[1], [0], [0], [1], [0, 0, 1, 1], [], []>} : vector<4x4xf32>, vector<4x256xf32>, vector<4x256xf32> -> vector<4x256xf32>
    %254 = arith.addf %244, %253 : vector<4x256xf32>
    %255 = vector.extract_strided_slice %186 {offsets = [1, 0, 0], sizes = [1, 4, 256], strides = [1, 1, 1]} : vector<2x4x256xf32> to vector<1x4x256xf32>
    %256 = vector.shape_cast %255 : vector<1x4x256xf32> to vector<4x256xf32>
    %cst_100 = arith.constant dense<0.000000e+00> : vector<4x256xf32>
    %257 = tpu.matmul %250, %256, %cst_100 {dimension_numbers = #tpu.dot_dimension_numbers<[1], [0], [0], [1], [0, 0, 1, 1], [], []>} : vector<4x4xf32>, vector<4x256xf32>, vector<4x256xf32> -> vector<4x256xf32>
    %258 = arith.addf %248, %257 : vector<4x256xf32>
    %c255_i32_101 = arith.constant 255 : i32
    %259 = tpu.dynamic_rotate %186 by %c255_i32_101 dim 2 : vector<2x4x256xf32>, i32 -> vector<2x4x256xf32>
    %cst_102 = arith.constant 0.000000e+00 : f32
    %260 = vector.shape_cast %20 : vector<1x1x256xi1> to vector<1x1x256xi1>
    %261 = vector.broadcast %260 : vector<1x1x256xi1> to vector<2x4x256xi1>
    %262 = vector.broadcast %cst_102 : f32 to vector<2x4x256xf32>
    %263 = arith.select %261, %259, %262 : vector<2x4x256xi1>, vector<2x4x256xf32>
    %c5_103 = arith.constant 5 : index
    %c0_104 = arith.constant 0 : index
    %c0_105 = arith.constant 0 : index
    %264 = vector.load %arg3[%c5_103, %c0_104, %c0_105] : memref<9x4x4xf32, #tpu.memory_space<vmem>>, vector<1x4x4xf32>
    %265 = vector.shape_cast %264 : vector<1x4x4xf32> to vector<4x4xf32>
    %266 = vector.extract_strided_slice %263 {offsets = [0, 0, 0], sizes = [1, 4, 256], strides = [1, 1, 1]} : vector<2x4x256xf32> to vector<1x4x256xf32>
    %267 = vector.shape_cast %266 : vector<1x4x256xf32> to vector<4x256xf32>
    %cst_106 = arith.constant dense<0.000000e+00> : vector<4x256xf32>
    %268 = tpu.matmul %265, %267, %cst_106 {dimension_numbers = #tpu.dot_dimension_numbers<[1], [0], [0], [1], [0, 0, 1, 1], [], []>} : vector<4x4xf32>, vector<4x256xf32>, vector<4x256xf32> -> vector<4x256xf32>
    %269 = arith.addf %254, %268 : vector<4x256xf32>
    %270 = vector.extract_strided_slice %263 {offsets = [1, 0, 0], sizes = [1, 4, 256], strides = [1, 1, 1]} : vector<2x4x256xf32> to vector<1x4x256xf32>
    %271 = vector.shape_cast %270 : vector<1x4x256xf32> to vector<4x256xf32>
    %cst_107 = arith.constant dense<0.000000e+00> : vector<4x256xf32>
    %272 = tpu.matmul %265, %271, %cst_107 {dimension_numbers = #tpu.dot_dimension_numbers<[1], [0], [0], [1], [0, 0, 1, 1], [], []>} : vector<4x4xf32>, vector<4x256xf32>, vector<4x256xf32> -> vector<4x256xf32>
    %273 = arith.addf %258, %272 : vector<4x256xf32>
    %c241_i32_108 = arith.constant 241 : i32
    %274 = tpu.dynamic_rotate %186 by %c241_i32_108 dim 2 : vector<2x4x256xf32>, i32 -> vector<2x4x256xf32>
    %cst_109 = arith.constant 0.000000e+00 : f32
    %275 = vector.shape_cast %25 : vector<1x1x256xi1> to vector<1x1x256xi1>
    %276 = vector.broadcast %275 : vector<1x1x256xi1> to vector<2x4x256xi1>
    %277 = vector.broadcast %cst_109 : f32 to vector<2x4x256xf32>
    %278 = arith.select %276, %274, %277 : vector<2x4x256xi1>, vector<2x4x256xf32>
    %c6_110 = arith.constant 6 : index
    %c0_111 = arith.constant 0 : index
    %c0_112 = arith.constant 0 : index
    %279 = vector.load %arg3[%c6_110, %c0_111, %c0_112] : memref<9x4x4xf32, #tpu.memory_space<vmem>>, vector<1x4x4xf32>
    %280 = vector.shape_cast %279 : vector<1x4x4xf32> to vector<4x4xf32>
    %281 = vector.extract_strided_slice %278 {offsets = [0, 0, 0], sizes = [1, 4, 256], strides = [1, 1, 1]} : vector<2x4x256xf32> to vector<1x4x256xf32>
    %282 = vector.shape_cast %281 : vector<1x4x256xf32> to vector<4x256xf32>
    %cst_113 = arith.constant dense<0.000000e+00> : vector<4x256xf32>
    %283 = tpu.matmul %280, %282, %cst_113 {dimension_numbers = #tpu.dot_dimension_numbers<[1], [0], [0], [1], [0, 0, 1, 1], [], []>} : vector<4x4xf32>, vector<4x256xf32>, vector<4x256xf32> -> vector<4x256xf32>
    %284 = arith.addf %269, %283 : vector<4x256xf32>
    %285 = vector.extract_strided_slice %278 {offsets = [1, 0, 0], sizes = [1, 4, 256], strides = [1, 1, 1]} : vector<2x4x256xf32> to vector<1x4x256xf32>
    %286 = vector.shape_cast %285 : vector<1x4x256xf32> to vector<4x256xf32>
    %cst_114 = arith.constant dense<0.000000e+00> : vector<4x256xf32>
    %287 = tpu.matmul %280, %286, %cst_114 {dimension_numbers = #tpu.dot_dimension_numbers<[1], [0], [0], [1], [0, 0, 1, 1], [], []>} : vector<4x4xf32>, vector<4x256xf32>, vector<4x256xf32> -> vector<4x256xf32>
    %288 = arith.addf %273, %287 : vector<4x256xf32>
    %c240_i32_115 = arith.constant 240 : i32
    %289 = tpu.dynamic_rotate %186 by %c240_i32_115 dim 2 : vector<2x4x256xf32>, i32 -> vector<2x4x256xf32>
    %cst_116 = arith.constant 0.000000e+00 : f32
    %290 = vector.shape_cast %27 : vector<1x1x256xi1> to vector<1x1x256xi1>
    %291 = vector.broadcast %290 : vector<1x1x256xi1> to vector<2x4x256xi1>
    %292 = vector.broadcast %cst_116 : f32 to vector<2x4x256xf32>
    %293 = arith.select %291, %289, %292 : vector<2x4x256xi1>, vector<2x4x256xf32>
    %c7_117 = arith.constant 7 : index
    %c0_118 = arith.constant 0 : index
    %c0_119 = arith.constant 0 : index
    %294 = vector.load %arg3[%c7_117, %c0_118, %c0_119] : memref<9x4x4xf32, #tpu.memory_space<vmem>>, vector<1x4x4xf32>
    %295 = vector.shape_cast %294 : vector<1x4x4xf32> to vector<4x4xf32>
    %296 = vector.extract_strided_slice %293 {offsets = [0, 0, 0], sizes = [1, 4, 256], strides = [1, 1, 1]} : vector<2x4x256xf32> to vector<1x4x256xf32>
    %297 = vector.shape_cast %296 : vector<1x4x256xf32> to vector<4x256xf32>
    %cst_120 = arith.constant dense<0.000000e+00> : vector<4x256xf32>
    %298 = tpu.matmul %295, %297, %cst_120 {dimension_numbers = #tpu.dot_dimension_numbers<[1], [0], [0], [1], [0, 0, 1, 1], [], []>} : vector<4x4xf32>, vector<4x256xf32>, vector<4x256xf32> -> vector<4x256xf32>
    %299 = arith.addf %284, %298 : vector<4x256xf32>
    %300 = vector.extract_strided_slice %293 {offsets = [1, 0, 0], sizes = [1, 4, 256], strides = [1, 1, 1]} : vector<2x4x256xf32> to vector<1x4x256xf32>
    %301 = vector.shape_cast %300 : vector<1x4x256xf32> to vector<4x256xf32>
    %cst_121 = arith.constant dense<0.000000e+00> : vector<4x256xf32>
    %302 = tpu.matmul %295, %301, %cst_121 {dimension_numbers = #tpu.dot_dimension_numbers<[1], [0], [0], [1], [0, 0, 1, 1], [], []>} : vector<4x4xf32>, vector<4x256xf32>, vector<4x256xf32> -> vector<4x256xf32>
    %303 = arith.addf %288, %302 : vector<4x256xf32>
    %c239_i32_122 = arith.constant 239 : i32
    %304 = tpu.dynamic_rotate %186 by %c239_i32_122 dim 2 : vector<2x4x256xf32>, i32 -> vector<2x4x256xf32>
    %cst_123 = arith.constant 0.000000e+00 : f32
    %305 = vector.shape_cast %32 : vector<1x1x256xi1> to vector<1x1x256xi1>
    %306 = vector.broadcast %305 : vector<1x1x256xi1> to vector<2x4x256xi1>
    %307 = vector.broadcast %cst_123 : f32 to vector<2x4x256xf32>
    %308 = arith.select %306, %304, %307 : vector<2x4x256xi1>, vector<2x4x256xf32>
    %c8_124 = arith.constant 8 : index
    %c0_125 = arith.constant 0 : index
    %c0_126 = arith.constant 0 : index
    %309 = vector.load %arg3[%c8_124, %c0_125, %c0_126] : memref<9x4x4xf32, #tpu.memory_space<vmem>>, vector<1x4x4xf32>
    %310 = vector.shape_cast %309 : vector<1x4x4xf32> to vector<4x4xf32>
    %311 = vector.extract_strided_slice %308 {offsets = [0, 0, 0], sizes = [1, 4, 256], strides = [1, 1, 1]} : vector<2x4x256xf32> to vector<1x4x256xf32>
    %312 = vector.shape_cast %311 : vector<1x4x256xf32> to vector<4x256xf32>
    %cst_127 = arith.constant dense<0.000000e+00> : vector<4x256xf32>
    %313 = tpu.matmul %310, %312, %cst_127 {dimension_numbers = #tpu.dot_dimension_numbers<[1], [0], [0], [1], [0, 0, 1, 1], [], []>} : vector<4x4xf32>, vector<4x256xf32>, vector<4x256xf32> -> vector<4x256xf32>
    %314 = arith.addf %299, %313 : vector<4x256xf32>
    %315 = vector.extract_strided_slice %308 {offsets = [1, 0, 0], sizes = [1, 4, 256], strides = [1, 1, 1]} : vector<2x4x256xf32> to vector<1x4x256xf32>
    %316 = vector.shape_cast %315 : vector<1x4x256xf32> to vector<4x256xf32>
    %cst_128 = arith.constant dense<0.000000e+00> : vector<4x256xf32>
    %317 = tpu.matmul %310, %316, %cst_128 {dimension_numbers = #tpu.dot_dimension_numbers<[1], [0], [0], [1], [0, 0, 1, 1], [], []>} : vector<4x4xf32>, vector<4x256xf32>, vector<4x256xf32> -> vector<4x256xf32>
    %318 = arith.addf %303, %317 : vector<4x256xf32>
    %319 = vector.shape_cast %314 : vector<4x256xf32> to vector<1x4x256xf32>
    %320 = vector.shape_cast %318 : vector<4x256xf32> to vector<1x4x256xf32>
    %321 = tpu.concatenate %319, %320 in 0 : vector<1x4x256xf32>, vector<1x4x256xf32> -> vector<2x4x256xf32>
    %cst_129 = arith.constant dense<0.000000e+00> : vector<2x4xf32>
    %322 = vector.multi_reduction <add>, %321, %cst_129 [2] : vector<2x4x256xf32> to vector<2x4xf32>
    %323 = vector.shape_cast %322 : vector<2x4xf32> to vector<2x4x1xf32>
    %cst_130 = arith.constant 2.560000e+02 : f32
    %324 = vector.broadcast %cst_130 : f32 to vector<2x4x1xf32>
    %325 = arith.divf %323, %324 : vector<2x4x1xf32>
    %326 = vector.broadcast %325 : vector<2x4x1xf32> to vector<2x4x256xf32>
    %327 = arith.subf %321, %326 : vector<2x4x256xf32>
    %328 = arith.mulf %327, %327 : vector<2x4x256xf32>
    %cst_131 = arith.constant dense<0.000000e+00> : vector<2x4xf32>
    %329 = vector.multi_reduction <add>, %328, %cst_131 [2] : vector<2x4x256xf32> to vector<2x4xf32>
    %330 = vector.shape_cast %329 : vector<2x4xf32> to vector<2x4x1xf32>
    %cst_132 = arith.constant 2.560000e+02 : f32
    %331 = vector.broadcast %cst_132 : f32 to vector<2x4x1xf32>
    %332 = arith.divf %330, %331 : vector<2x4x1xf32>
    %cst_133 = arith.constant 9.99999974E-6 : f32
    %333 = vector.broadcast %cst_133 : f32 to vector<2x4x1xf32>
    %334 = arith.addf %332, %333 : vector<2x4x1xf32>
    %335 = math.rsqrt %334 : vector<2x4x1xf32>
    %336 = vector.broadcast %335 : vector<2x4x1xf32> to vector<2x4x256xf32>
    %337 = arith.mulf %327, %336 : vector<2x4x256xf32>
    %338 = arith.addf %337, %33 : vector<2x4x256xf32>
    %c0_134 = arith.constant 0 : index
    %c0_135 = arith.constant 0 : index
    %c0_136 = arith.constant 0 : index
    %339 = vector.load %arg4[%c0_134, %c0_135, %c0_136] : memref<2x4x256xf32, #tpu.memory_space<vmem>>, vector<2x4x256xf32>
    tpu.vector_store %arg4[%c0_134, %c0_135, %c0_136], %338 {strides = array<i32>} : memref<2x4x256xf32, #tpu.memory_space<vmem>>, vector<2x4x256xf32>,
    return
  }
  func.func @transform_0(%arg0: i32) -> (i32, i32, i32) {
    %c0_i32 = arith.constant 0 : i32
    %c0_i32_0 = arith.constant 0 : i32
    %c0_i32_1 = arith.constant 0 : i32
    %c0_i32_2 = arith.constant 0 : i32
    return %c0_i32, %c0_i32_0, %c0_i32_1 : i32, i32, i32
  }
  func.func @transform_1(%arg0: i32) -> (i32, i32, i32) {
    %c0_i32 = arith.constant 0 : i32
    %c0_i32_0 = arith.constant 0 : i32
    %c0_i32_1 = arith.constant 0 : i32
    %c0_i32_2 = arith.constant 0 : i32
    return %c0_i32, %c0_i32_0, %c0_i32_1 : i32, i32, i32
  }
  func.func @transform_2(%arg0: i32) -> (i32, i32, i32) {
    %c0_i32 = arith.constant 0 : i32
    %c0_i32_0 = arith.constant 0 : i32
    %c0_i32_1 = arith.constant 0 : i32
    %c0_i32_2 = arith.constant 0 : i32
    return %c0_i32, %c0_i32_0, %c0_i32_1 : i32, i32, i32
  }
  func.func @transform_3(%arg0: i32) -> (i32, i32, i32) {
    %c0_i32 = arith.constant 0 : i32
    %c0_i32_0 = arith.constant 0 : i32
    %c0_i32_1 = arith.constant 0 : i32
    %c0_i32_2 = arith.constant 0 : i32
    return %c0_i32, %c0_i32_0, %c0_i32_1 : i32, i32, i32
  }
}

</mosaic_0001>

<bundles_post_ra>
// kernel: resblock_forward.1
= control target key start
LH: loop header
LB: loop body
LE: loop exit
PB: predicated region body
PF: predicated region fallthrough
CT: control target
= control target key end

     0   :  { %s2566_s16 = smov 17   ;;  %s2568_s17 = smov 15   ;;  %v14_v39 = vlaneseq  ;;  %v3401_v49 = vmov 0  ;;  %v3403_v50 = vmov 0  ;;  %v3405_v51 = vmov 0  ;;  %s3370_s0 = inlined_call_operand.vmem [shape: f32[2,4,256], index: 0, kind: input, shape index: {}]   ;;  %s3371_s1 = inlined_call_operand.vmem [shape: f32[9,4,4], index: 1, kind: input, shape index: {}]   ;;  %s3372_s2 = inlined_call_operand.vmem [shape: f32[9,4,4], index: 2, kind: input, shape index: {}]   ;;  %s3373_s3 = inlined_call_operand.vmem [shape: f32[2,4,256], index: 3, kind: output, shape index: {}]  }
   0x1   :  { %v2598_v0 = vld [vmem:[%s3370_s0] sm:$0xff]  ;;  %v2603_v1 = vld [vmem:[%s3370_s0 + $0x8] sm:$0xff]  ;;  %s2567_s0 = smov 16   ;;  %s2569_s18 = smov 1   ;;  %v3407_v52 = vmov 0  ;;  %v3411_v54 = vmov 0 }
   0x2   :  { %41 = vst [vmem:[#allocation1] ss:$2 sm:$0xff] %v2598_v0  ;;  %s2570_s19 = smov 127   ;;  %s2571_s20 = smov 113   ;;  %v2665_v40 = vand.u32 127, %v14_v39  ;;  %vm3384_vm7 = vcmask 1043456  }
   0x3   :  { %45 = vst [vmem:[#allocation1 + $0x10] ss:$2 sm:$0xff] %v2603_v1  ;;  %s2572_s21 = smov 112   ;;  %s2573_s22 = smov 111   ;;  %v73_v59 = vld [vmem:[%s3371_s1] sm:$0xf] }
   0x4   :  { %v2668_v42 = vadd.s32 128, %v2665_v40  ;;  %v17_v43 = vshra.s32 %v2665_v40, 4  ;;  %v19_v44 = vand.u32 15, %v2665_v40  ;;  %vm3377_vm5 = vcmp.lt.s32.totalorder %v2665_v40, 17 }
   0x5   :  { %vm3379_vm8 = vcmask 31744   ;;  %vm3376_vm9 = vcmp.lt.s32.totalorder %v2665_v40, 16  ;;  %vm3374_vm12 = vcmp.lt.s32.totalorder %v2665_v40, 15  ;;  %vm3375_vm15 = vcmp.lt.s32.totalorder %v2665_v40, 1 }
   0x6   :  { %v18_v46 = vshra.s32 %v2668_v42, 4  ;;  %v20_v47 = vand.u32 15, %v2668_v42  ;;  %vm2678_vm0 = vcmp.ge.s32.totalorder %v17_v43, 1  ;;  %vm2682_vm1 = vcmp.ge.s32.totalorder %v19_v44, 1 }
   0x7   :  { %v3402_v49 = vsel %vm2678_vm0, 4294967295, %v3401_v49  ;;  %v3404_v50 = vsel %vm2682_vm1, 4294967295, %v3403_v50  ;;  %vm2700_vm4 = vmand %vm2678_vm0, %vm2682_vm1  ;;  %vm2752_vm10 = vcmp.le.s32.totalorder %v19_v44, 14 }
   0x8   :  { %vm2688_vm2 = vcmp.ge.s32.totalorder %v18_v46, 1  ;;  %vm2692_vm3 = vcmp.ge.s32.totalorder %v20_v47, 1  ;;  %vm2758_vm11 = vcmp.le.s32.totalorder %v20_v47, 14  ;;  %vm2767_vm13 = vmand %vm2678_vm0, %vm2752_vm10 }
   0x9   :  { %v42_v2 = vld.sshfl [vmem:[#allocation1] sm:$0xff pattern:$0x75316420]  ;;  %v43_v3 = vld.sshfl [vmem:[#allocation1 + $0x8] sm:$0xff pattern:$0x75316420]  ;;  %vm2709_vm6 = vmand %vm2688_vm2, %vm2692_vm3 }
   0xa   :  { %52 = vrot.lane.b32.xlu1 %v42_v2, %s2566_s16  ;;  %74 = vst [vmem:[#allocation1] ss:$2 sm:$0xff] %v2598_v0  ;;  %v46_v4 = vld.sshfl [vmem:[#allocation1 + $0x10] sm:$0xff pattern:$0x75316420]  ;;  %v3406_v51 = vsel %vm2688_vm2, 4294967295, %v3405_v51  ;;  %vm2775_vm14 = vmand %vm2688_vm2, %vm2758_vm11 }
   0xb   :  { %v47_v5 = vld.sshfl [vmem:[#allocation1 + $0x18] sm:$0xff pattern:$0x75316420]  ;;  %v3408_v52 = vsel %vm2692_vm3, 4294967295, %v3407_v52  ;;  %v3412_v54 = vsel %vm2709_vm6, 4294967295, %v3411_v54 }
   0xc   :  { %78 = vst [vmem:[#allocation1 + $0x10] ss:$2 sm:$0xff] %v2603_v1 }
  0x11   :  { %v75_v6 = vld.sshfl [vmem:[#allocation1] sm:$0xff pattern:$0x75316420]  ;;  %v76_v7 = vld.sshfl [vmem:[#allocation1 + $0x8] sm:$0xff pattern:$0x75316420] }
  0x12   :  { %56 = vrot.lane.b32.xlu1 %v43_v3, %s2566_s16  ;;  %85 = vrot.lane.b32.xlu0 %v75_v6, %s2567_s0  ;;  %300 = vst [vmem:[#allocation1] ss:$2 sm:$0xff] %v2598_v0 }
  0x13   :  { %v79_v8 = vld.sshfl [vmem:[#allocation1 + $0x10] sm:$0xff pattern:$0x75316420]  ;;  %v80_v9 = vld.sshfl [vmem:[#allocation1 + $0x18] sm:$0xff pattern:$0x75316420] }
  0x14   :  { %304 = vst [vmem:[#allocation1 + $0x10] ss:$2 sm:$0xff] %v2603_v1  ;;  %87 = vrot.lane.b32.xlu2 %v79_v8, %s2567_s0 }
  0x19   :  { %v302_v10 = vld.sshfl [vmem:[#allocation1 + $0x8] sm:$0xff pattern:$0x75316420]  ;;  %v301_v11 = vld.sshfl [vmem:[#allocation1] sm:$0xff pattern:$0x75316420] }
  0x1a   :  { %58 = vrot.lane.b32.xlu1 %v47_v5, %s2566_s16  ;;  %89 = vrot.lane.b32.xlu0 %v76_v7, %s2567_s0  ;;  %433 = vst [vmem:[#allocation1] ss:$2 sm:$0xff] %v2598_v0  ;;  %v2387_v5 = vld [vmem:[%s3371_s1 + $0x4] sm:$0xf] }
  0x1b   :  { %v305_v12 = vld.sshfl [vmem:[#allocation1 + $0x10] sm:$0xff pattern:$0x75316420]  ;;  %v306_v13 = vld.sshfl [vmem:[#allocation1 + $0x18] sm:$0xff pattern:$0x75316420] }
  0x1c   :  { %437 = vst [vmem:[#allocation1 + $0x10] ss:$2 sm:$0xff] %v2603_v1  ;;  %91 = vrot.lane.b32.xlu2 %v80_v9, %s2567_s0 }
  0x21   :  { %v435_v14 = vld.sshfl [vmem:[#allocation1 + $0x8] sm:$0xff pattern:$0x75316420]  ;;  %v434_v15 = vld.sshfl [vmem:[#allocation1] sm:$0xff pattern:$0x75316420] }
  0x22   :  { %313 = vrot.lane.b32.xlu1 %v305_v12, %s2568_s17  ;;  %54 = vrot.lane.b32.xlu0 %v46_v4, %s2566_s16  ;;  %568 = vst [vmem:[#allocation1] ss:$2 sm:$0xff] %v2598_v0 }
  0x23   :  { %v438_v16 = vld.sshfl [vmem:[#allocation1 + $0x10] sm:$0xff pattern:$0x75316420]  ;;  %v439_v17 = vld.sshfl [vmem:[#allocation1 + $0x18] sm:$0xff pattern:$0x75316420] }
  0x24   :  { %673 = vst [vmem:[#allocation1 + $0x10] ss:$2 sm:$0xff] %v2603_v1  ;;  %311 = vrot.lane.b32.xlu2 %v301_v11, %s2568_s17 }
  0x29   :  { %v2625_v18 = vld.sshfl [vmem:[#allocation1] sm:$0xff pattern:$0x75316420]  ;;  %v2627_v19 = vld.sshfl [vmem:[#allocation1 + $0x8] sm:$0xff pattern:$0x75316420] }
  0x2a   :  { %315 = vrot.lane.b32.xlu0 %v302_v10, %s2568_s17  ;;  %448 = vrot.lane.b32.xlu1 %v435_v14, %s2569_s18  ;;  %620 = vst [vmem:[#allocation1] ss:$2 sm:$0xff] %v2603_v1 }
  0x2b   :  { %v675_v20 = vld.sshfl [vmem:[#allocation1 + $0x18] sm:$0xff pattern:$0x75316420]  ;;  %v674_v21 = vld.sshfl [vmem:[#allocation1 + $0x10] sm:$0xff pattern:$0x75316420] }
  0x2c   :  { %317 = vrot.lane.b32.xlu2 %v306_v13, %s2568_s17  ;;  %806 = vst [vmem:[#allocation1 + $0x10] ss:$2 sm:$0xff] %v2603_v1  ;;  %v3417_v13 = vmov 0 }
  0x2d   :  { %v3418_v13 = vsel %vm2767_vm13, 4294967295, %v3417_v13 }
  0x31   :  { %v2634_v22 = vld.sshfl [vmem:[#allocation1] sm:$0xff pattern:$0x75316420]  ;;  %v2636_v23 = vld.sshfl [vmem:[#allocation1 + $0x8] sm:$0xff pattern:$0x75316420] }
  0x32   :  { %686 = vrot.lane.b32.xlu1 %v675_v20, %s2570_s19  ;;  %444 = vrot.lane.b32.xlu0 %v434_v15, %s2569_s18  ;;  %669 = vst [vmem:[#allocation1] ss:$2 sm:$0xff] %v2598_v0 }
  0x33   :  { %v807_v24 = vld.sshfl [vmem:[#allocation1 + $0x10] sm:$0xff pattern:$0x75316420]  ;;  %v808_v25 = vld.sshfl [vmem:[#allocation1 + $0x18] sm:$0xff pattern:$0x75316420] }
  0x34   :  { %446 = vrot.lane.b32.xlu2 %v438_v16, %s2569_s18  ;;  %939 = vst [vmem:[#allocation1 + $0x10] ss:$2 sm:$0xff] %v2603_v1  ;;  %v3419_v16 = vmov 0 }
  0x35   :  { %v3420_v16 = vsel %vm2775_vm14, 4294967295, %v3419_v16 }
  0x39   :  { %v670_v26 = vld.sshfl [vmem:[#allocation1] sm:$0xff pattern:$0x75316420]  ;;  %v671_v27 = vld.sshfl [vmem:[#allocation1 + $0x8] sm:$0xff pattern:$0x75316420] }
  0x3a   :  { %450 = vrot.lane.b32.xlu0 %v439_v17, %s2569_s18  ;;  %680 = vrot.lane.b32.xlu1 %v670_v26, %s2570_s19  ;;  %802 = vst [vmem:[#allocation1] ss:$2 sm:$0xff] %v2598_v0 }
  0x3b   :  { %v940_v28 = vld.sshfl [vmem:[#allocation1 + $0x10] sm:$0xff pattern:$0x75316420]  ;;  %v941_v29 = vld.sshfl [vmem:[#allocation1 + $0x18] sm:$0xff pattern:$0x75316420] }
  0x3c   :  { %819 = vrot.lane.b32.xlu2 %v808_v25, %s2571_s20  ;;  %1072 = vst [vmem:[#allocation1 + $0x10] ss:$2 sm:$0xff] %v2603_v1 }
  0x41   :  { %v804_v30 = vld.sshfl [vmem:[#allocation1 + $0x8] sm:$0xff pattern:$0x75316420]  ;;  %v803_v31 = vld.sshfl [vmem:[#allocation1] sm:$0xff pattern:$0x75316420] }
  0x42   :  { %682 = vrot.lane.b32.xlu0 %v674_v21, %s2570_s19  ;;  %815 = vrot.lane.b32.xlu1 %v807_v24, %s2571_s20  ;;  %935 = vst [vmem:[#allocation1] ss:$2 sm:$0xff] %v2598_v0 }
  0x43   :  { %v1073_v32 = vld.sshfl [vmem:[#allocation1 + $0x10] sm:$0xff pattern:$0x75316420]  ;;  %v1074_v33 = vld.sshfl [vmem:[#allocation1 + $0x18] sm:$0xff pattern:$0x75316420] }
  0x44   :  { %684 = vrot.lane.b32.xlu2 %v671_v27, %s2570_s19  ;;  %2360 = vst [vmem:[#allocation1 + $0x10] ss:$2 sm:$0xff] %v2603_v1 }
  0x49   :  { %v937_v34 = vld.sshfl [vmem:[#allocation1 + $0x8] sm:$0xff pattern:$0x75316420]  ;;  %v936_v35 = vld.sshfl [vmem:[#allocation1] sm:$0xff pattern:$0x75316420] }
  0x4a   :  { %817 = vrot.lane.b32.xlu0 %v804_v30, %s2571_s20  ;;  %950 = vrot.lane.b32.xlu1 %v937_v34, %s2572_s21  ;;  %1068 = vst [vmem:[#allocation1] ss:$2 sm:$0xff] %v2598_v0  ;;  %v2404_v34 = vld [vmem:[%s3371_s1 + $0x8] sm:$0xf] }
  0x4c   :  { %813 = vrot.lane.b32.xlu2 %v803_v31, %s2571_s20 }
  0x51   :  { %v1069_v36 = vld.sshfl [vmem:[#allocation1] sm:$0xff pattern:$0x75316420]  ;;  %v1070_v37 = vld.sshfl [vmem:[#allocation1 + $0x8] sm:$0xff pattern:$0x75316420] }
  0x52   :  { %946 = vrot.lane.b32.xlu0 %v936_v35, %s2572_s21  ;;  %1079 = vrot.lane.b32.xlu1 %v1069_v36, %s2573_s22  ;;  %2356 = vst [vmem:[#allocation1] ss:$2 sm:$0xff] %v2598_v0 }
  0x54   :  { %948 = vrot.lane.b32.xlu2 %v940_v28, %s2572_s21 }
  0x5a   :  { %952 = vrot.lane.b32.xlu0 %v941_v29, %s2572_s21  ;;  %1085 = vrot.lane.b32.xlu1 %v1074_v33, %s2573_s22 }
  0x5c   :  { %1083 = vrot.lane.b32.xlu2 %v1070_v37, %s2573_s22 }
  0x62   :  { %1081 = vrot.lane.b32.xlu0 %v1073_v32, %s2573_s22 }
  0x6e   :  { %v88_v38 = vpop.permute.xlu2 %87 }
  0x76   :  { %v92_v41 = vpop.permute.xlu2 %91 }
  0x77   :  { %v95_v63 = vsel %vm3376_vm9, %v88_v38, %v92_v41  ;;  %v97_v0 = vsel %vm3376_vm9, %v92_v41, %v88_v38 }
  0x78   :  { %v104_v8 = vsel %vm2678_vm0, %v97_v0, 0.0  ;;  %v105_v9 = vsel %vm2688_vm2, %v95_v63, 0.0 }
  0x7c   :  { %v53_v45 = vpop.permute.xlu1 %52 }
  0x7e   :  { %v2674_v48 = vpop.permute.xlu2 %311 }
  0x84   :  { %v57_v55 = vpop.permute.xlu1 %56  ;;  %v86_v56 = vpop.permute.xlu0 %85 }
  0x85   :  { %v63_v57 = vsel %vm3377_vm5, %v57_v55, %v53_v45  ;;  %v61_v58 = vsel %vm3377_vm5, %v53_v45, %v57_v55  ;;  %v2413_v45 = vld [vmem:[%s3371_s1 + $0xc] sm:$0xf] }
  0x86   :  { %v69_v60 = vsel %vm2700_vm4, %v63_v57, 0.0  ;;  %v70_v61 = vsel %vm2709_vm6, %v61_v58, 0.0  ;;  %v318_v62 = vpop.permute.xlu2 %317 }
  0x87   :  { %2392 = vmatpush.msk.msra.mxu2 %vm3384_vm7, %v69_v60  ;;  %2394 = vmatpush.msk.msra.mxu3 %vm3384_vm7, %v70_v61  ;;  %v2422_v61 = vld [vmem:[%s3371_s1 + $0x10] sm:$0xf] }
  0x88   :  { %2393 = vmatmul.msk.f32.vlgmr.msra.gmra.mxu2 %vm3379_vm8, %v73_v59  ;;  %2395 = vmatmul.msk.f32.vlgmr.msra.gmra.mxu3 %vm3379_vm8, %v73_v59 }
  0x8c   :  { %v59_v1 = vpop.permute.xlu1 %58  ;;  %v90_v2 = vpop.permute.xlu0 %89 }
  0x8d   :  { %v96_v3 = vsel %vm3376_vm9, %v90_v2, %v86_v56  ;;  %v94_v4 = vsel %vm3376_vm9, %v86_v56, %v90_v2  ;;  %vm2878_vm9 = vcmp.le.s32.totalorder %v18_v46, 14 }
  0x8e   :  { %v102_v6 = vsel %vm2678_vm0, %v96_v3, 0.0  ;;  %v103_v7 = vsel %vm2688_vm2, %v94_v4, 0.0  ;;  %v447_v10 = vpop.permute.xlu2 %446 }
  0x8f   :  { %2388 = vmatpush.msk.msra.mxu0 %vm3384_vm7, %v102_v6  ;;  %2390 = vmatpush.msk.msra.mxu1 %vm3384_vm7, %v103_v7 }
  0x90   :  { %2389 = vmatmul.msk.f32.vlgmr.msra.gmra.mxu0 %vm3379_vm8, %v2387_v5  ;;  %2391 = vmatmul.msk.f32.vlgmr.msra.gmra.mxu1 %vm3379_vm8, %v2387_v5 }
  0x91   :  { %2396 = vmatpush.msk.msrb.mxu0 %vm3384_vm7, %v104_v8  ;;  %2398 = vmatpush.msk.msrb.mxu1 %vm3384_vm7, %v105_v9  ;;  %v2431_v8 = vld [vmem:[%s3371_s1 + $0x14] sm:$0xf] }
  0x94   :  { %v314_v14 = vpop.permute.xlu1 %313  ;;  %v55_v15 = vpop.permute.xlu0 %54 }
  0x95   :  { %v62_v17 = vsel %vm3377_vm5, %v55_v15, %v59_v1  ;;  %v64_v20 = vsel %vm3377_vm5, %v59_v1, %v55_v15  ;;  %v321_v21 = vsel %vm3374_vm12, %v314_v14, %v318_v62  ;;  %v323_v24 = vsel %vm3374_vm12, %v318_v62, %v314_v14 }
  0x96   :  { %v71_v25 = vsel %vm2700_vm4, %v64_v20, 0.0  ;;  %v72_v26 = vsel %vm2709_vm6, %v62_v17, 0.0  ;;  %v330_v27 = vsel %vm2767_vm13, %v323_v24, 0.0  ;;  %v331_v28 = vsel %vm2775_vm14, %v321_v21, 0.0  ;;  %v2801_v29 = vpop.permute.xlu2 %819 }
  0x97   :  { %2400 = vmatpush.msk.msrb.mxu2 %vm3384_vm7, %v71_v25  ;;  %2402 = vmatpush.msk.msrb.mxu3 %vm3384_vm7, %v72_v26  ;;  %vm3429_vm5 = vcmp.lt.s32.totalorder %v2665_v40, 127  ;;  %vm3441_vm6 = vcmp.lt.s32.totalorder %v2665_v40, 113  ;;  %v2440_v26 = vld [vmem:[%s3371_s1 + $0x18] sm:$0xf] }
  0x98   :  { %2397 = vmatmul.msk.f32.vlgmr.msrb.gmra.mxu0 %vm3379_vm8, %v2387_v5  ;;  %2399 = vmatmul.msk.f32.vlgmr.msrb.gmra.mxu1 %vm3379_vm8, %v2387_v5 }
  0x99   :  { %2401 = vmatmul.msk.f32.vlgmr.msrb.gmra.mxu2 %vm3379_vm8, %v73_v59  ;;  %2403 = vmatmul.msk.f32.vlgmr.msrb.gmra.mxu3 %vm3379_vm8, %v73_v59 }
  0x9a   :  { %2409 = vmatpush.msk.msra.mxu2 %vm3384_vm7, %v330_v27  ;;  %2411 = vmatpush.msk.msra.mxu3 %vm3384_vm7, %v331_v28 }
  0x9c   :  { %v316_v30 = vpop.permute.xlu0 %315  ;;  %v449_v31 = vpop.permute.xlu1 %448 }
  0x9d   :  { %v320_v32 = vsel %vm3374_vm12, %v2674_v48, %v316_v30  ;;  %v322_v33 = vsel %vm3374_vm12, %v316_v30, %v2674_v48  ;;  %vm3378_vm12 = vcmp.lt.s32.totalorder %v2665_v40, 127  ;;  %v3449_v30 = vmov 0 }
  0x9e   :  { %v328_v35 = vsel %vm2767_vm13, %v322_v33, 0.0  ;;  %v329_v36 = vsel %vm2775_vm14, %v320_v32, 0.0  ;;  %v685_v37 = vpop.permute.xlu2 %684  ;;  %vm3431_vm14 = vcmp.lt.s32.totalorder %v2665_v40, 113 }
  0x9f   :  { %2405 = vmatpush.msk.msra.mxu0 %vm3384_vm7, %v328_v35  ;;  %2407 = vmatpush.msk.msra.mxu1 %vm3384_vm7, %v329_v36 }
  0xa0   :  { %2406 = vmatmul.msk.f32.vlgmr.msra.gmra.mxu0 %vm3379_vm8, %v2404_v34  ;;  %2408 = vmatmul.msk.f32.vlgmr.msra.gmra.mxu1 %vm3379_vm8, %v2404_v34 }
  0xa1   :  { %2410 = vmatmul.msk.f32.vlgmr.msra.gmra.mxu2 %vm3379_vm8, %v2404_v34  ;;  %2412 = vmatmul.msk.f32.vlgmr.msra.gmra.mxu3 %vm3379_vm8, %v2404_v34 }
  0xa4   :  { %v687_v38 = vpop.permute.xlu1 %686  ;;  %v445_v39 = vpop.permute.xlu0 %444 }
  0xa5   :  { %v453_v41 = vsel %vm3375_vm15, %v445_v39, %v449_v31  ;;  %v455_v44 = vsel %vm3375_vm15, %v449_v31, %v445_v39 }
  0xa6   :  { %v461_v47 = vsel %vm2682_vm1, %v455_v44, 0.0  ;;  %v462_v48 = vsel %vm2692_vm3, %v453_v41, 0.0  ;;  %v814_v62 = vpop.permute.xlu2 %813 }
  0xa7   :  { %2414 = vmatpush.msk.msrb.mxu0 %vm3384_vm7, %v461_v47  ;;  %2416 = vmatpush.msk.msrb.mxu1 %vm3384_vm7, %v462_v48 }
  0xa8   :  { %2415 = vmatmul.msk.f32.vlgmr.msrb.gmra.mxu0 %vm3379_vm8, %v2413_v45  ;;  %2417 = vmatmul.msk.f32.vlgmr.msrb.gmra.mxu1 %vm3379_vm8, %v2413_v45 }
  0xa9   :  { %2423 = vmatpush.msk.msra.mxu0 %vm3384_vm7, %v2625_v18  ;;  %2425 = vmatpush.msk.msra.mxu1 %vm3384_vm7, %v2627_v19 }
  0xac   :  { %v451_v55 = vpop.permute.xlu0 %450  ;;  %v681_v56 = vpop.permute.xlu1 %680 }
  0xad   :  { %v454_v57 = vsel %vm3375_vm15, %v447_v10, %v451_v55  ;;  %v456_v58 = vsel %vm3375_vm15, %v451_v55, %v447_v10  ;;  %v689_v59 = vsel %vm3378_vm12, %v681_v56, %v685_v37  ;;  %v691_v60 = vsel %vm3378_vm12, %v685_v37, %v681_v56  ;;  %v2458_v56 = vld [vmem:[%s3371_s1 + $0x20] sm:$0xf] }
  0xae   :  { %v463_v18 = vsel %vm2682_vm1, %v456_v58, 0.0  ;;  %v464_v19 = vsel %vm2692_vm3, %v454_v57, 0.0  ;;  %v697_v63 = vsel %vm2752_vm10, %v689_v59, 0.0  ;;  %v698_v0 = vsel %vm2758_vm11, %v691_v60, 0.0  ;;  %v949_v14 = vpop.permute.xlu2 %948 }
  0xaf   :  { %2418 = vmatpush.msk.msrb.mxu2 %vm3384_vm7, %v463_v18  ;;  %2420 = vmatpush.msk.msrb.mxu3 %vm3384_vm7, %v464_v19  ;;  %vm2870_vm15 = vcmp.le.s32.totalorder %v17_v43, 14  ;;  %v2520_v43 = vld [vmem:[%s3372_s2 + $0x18] sm:$0xf] }
  0xb0   :  { %2419 = vmatmul.msk.f32.vlgmr.msrb.gmra.mxu2 %vm3379_vm8, %v2413_v45  ;;  %2421 = vmatmul.msk.f32.vlgmr.msrb.gmra.mxu3 %vm3379_vm8, %v2413_v45  ;;  %vm2891_vm12 = vmand %vm2870_vm15, %vm2682_vm1 }
  0xb1   :  { %2424 = vmatmul.msk.f32.vlgmr.msra.gmra.mxu0 %vm3379_vm8, %v2422_v61  ;;  %2426 = vmatmul.msk.f32.vlgmr.msra.gmra.mxu1 %vm3379_vm8, %v2422_v61  ;;  %vm2901_vm8 = vmand %vm2878_vm9, %vm2692_vm3 }
  0xb2   :  { %2427 = vmatpush.msk.msra.mxu2 %vm3384_vm7, %v2634_v22  ;;  %2429 = vmatpush.msk.msra.mxu3 %vm3384_vm7, %v2636_v23  ;;  %v3427_v22 = vmov 0  ;;  %vm3430_vm1 = vmmov %vm3429_vm5 }
  0xb3   :  { %2432 = vmatpush.msk.msrb.mxu0 %vm3384_vm7, %v697_v63  ;;  %2434 = vmatpush.msk.msrb.mxu1 %vm3384_vm7, %v698_v0  ;;  %v3428_v22 = vsel %vm2901_vm8, 4294967295, %v3427_v22  ;;  %vm3432_vm7 = vmmov %vm3431_vm14 }
  0xb4   :  { %v683_v42 = vpop.permute.xlu0 %682  ;;  %v816_v23 = vpop.permute.xlu1 %815 }
  0xb5   :  { %v690_v46 = vsel %vm3429_vm5, %v683_v42, %v687_v38  ;;  %v692_v3 = vsel %vm3430_vm1, %v687_v38, %v683_v42  ;;  %v823_v4 = vsel %vm3431_vm14, %v816_v23, %v2801_v29  ;;  %v825_v5 = vsel %vm3432_vm7, %v2801_v29, %v816_v23  ;;  %v2449_v38 = vld [vmem:[%s3371_s1 + $0x1c] sm:$0xf] }
  0xb6   :  { %v699_v6 = vsel %vm2752_vm10, %v690_v46, 0.0  ;;  %v700_v7 = vsel %vm2758_vm11, %v692_v3, 0.0  ;;  %v832_v9 = vsel %vm2891_vm12, %v823_v4, 0.0  ;;  %v833_v10 = vsel %vm2901_vm8, %v825_v5, 0.0  ;;  %v1084_v27 = vpop.permute.xlu2 %1083 }
  0xb7   :  { %vm3433_vm1 = vcmask 1043456   ;;  %vm3435_vm7 = vcmask 31744  }
  0xb8   :  { %2436 = vmatpush.msk.msrb.mxu2 %vm3433_vm1, %v699_v6  ;;  %vm3434_vm5 = vmmov %vm3433_vm1 }
  0xb9   :  { %2438 = vmatpush.msk.msrb.mxu3 %vm3434_vm5, %v700_v7  ;;  %2428 = vmatmul.msk.f32.vlgmr.msra.gmra.mxu2 %vm3435_vm7, %v2422_v61  ;;  %vm3436_vm14 = vmmov %vm3435_vm7 }
  0xba   :  { %2430 = vmatmul.msk.f32.vlgmr.msra.gmra.mxu3 %vm3436_vm14, %v2422_v61  ;;  %vm3437_vm3 = vmmov %vm3435_vm7  ;;  %vm3396_vm7 = vcmp.lt.s32.totalorder %v2665_v40, 112  ;;  %vm3395_vm14 = vcmp.lt.s32.totalorder %v2665_v40, 111 }
  0xbb   :  { %2433 = vmatmul.msk.f32.vlgmr.msrb.gmra.mxu0 %vm3437_vm3, %v2431_v8  ;;  %vm3438_vm13 = vmmov %vm3437_vm3 }
  0xbc   :  { %2435 = vmatmul.msk.f32.vlgmr.msrb.gmra.mxu1 %vm3438_vm13, %v2431_v8  ;;  %vm3439_vm2 = vmmov %vm3433_vm1  ;;  %v818_v15 = vpop.permute.xlu0 %817  ;;  %v951_v17 = vpop.permute.xlu1 %950 }
  0xbd   :  { %2445 = vmatpush.msk.msra.mxu2 %vm3439_vm2, %v832_v9  ;;  %vm3440_vm0 = vmmov %vm3433_vm1  ;;  %v822_v20 = vsel %vm3441_vm6, %v814_v62, %v818_v15 }
  0xbe   :  { %2447 = vmatpush.msk.msra.mxu3 %vm3440_vm0, %v833_v10  ;;  %vm3442_vm1 = vmmov %vm3441_vm6  ;;  %v830_v24 = vsel %vm2891_vm12, %v822_v20, 0.0 }
  0xbf   :  { %v824_v21 = vsel %vm3442_vm1, %v818_v15, %v814_v62  ;;  %vm3443_vm2 = vmmov %vm3440_vm0 }
  0xc0   :  { %v831_v25 = vsel %vm2901_vm8, %v824_v21, 0.0  ;;  %2441 = vmatpush.msk.msra.mxu0 %vm3443_vm2, %v830_v24  ;;  %vm3444_vm6 = vmmov %vm3437_vm3 }
  0xc1   :  { %2443 = vmatpush.msk.msra.mxu1 %vm3440_vm0, %v831_v25  ;;  %2437 = vmatmul.msk.f32.vlgmr.msrb.gmra.mxu2 %vm3437_vm3, %v2431_v8  ;;  %vm3445_vm13 = vmmov %vm3437_vm3 }
  0xc2   :  { %2439 = vmatmul.msk.f32.vlgmr.msrb.gmra.mxu3 %vm3444_vm6, %v2431_v8  ;;  %vm3446_vm5 = vmmov %vm3437_vm3 }
  0xc3   :  { %2442 = vmatmul.msk.f32.vlgmr.msra.gmra.mxu0 %vm3445_vm13, %v2440_v26  ;;  %vm2957_vm1 = vmand %vm2870_vm15, %vm2752_vm10 }
  0xc4   :  { %2444 = vmatmul.msk.f32.vlgmr.msra.gmra.mxu1 %vm3446_vm5, %v2440_v26  ;;  %v947_v29 = vpop.permute.xlu0 %946  ;;  %vm2965_vm2 = vmand %vm2878_vm9, %vm2758_vm11  ;;  %v1080_v31 = vpop.permute.xlu1 %1079 }
  0xc5   :  { %v3450_v30 = vsel %vm2965_vm2, 4294967295, %v3449_v30  ;;  %v955_v32 = vsel %vm3396_vm7, %v947_v29, %v951_v17  ;;  %v957_v33 = vsel %vm3396_vm7, %v951_v17, %v947_v29  ;;  %v1088_v34 = vsel %vm3395_vm14, %v1080_v31, %v1084_v27  ;;  %vm3451_vm3 = vmmov %vm3440_vm0 }
  0xc6   :  { %v1090_v35 = vsel %vm3395_vm14, %v1084_v27, %v1080_v31  ;;  %v963_v36 = vsel %vm2870_vm15, %v955_v32, 0.0  ;;  %v964_v37 = vsel %vm2878_vm9, %v957_v33, 0.0  ;;  %v1096_v39 = vsel %vm2957_vm1, %v1088_v34, 0.0  ;;  %vm3452_vm6 = vmmov %vm3446_vm5 }
  0xc7   :  { %2450 = vmatpush.msk.msrb.mxu0 %vm3440_vm0, %v963_v36  ;;  %2452 = vmatpush.msk.msrb.mxu1 %vm3451_vm3, %v964_v37  ;;  %v1097_v41 = vsel %vm2965_vm2, %v1090_v35, 0.0  ;;  %vm3453_vm13 = vmmov %vm3446_vm5 }
  0xc8   :  { %vm3454_vm14 = vmmov %vm3446_vm5 }
  0xc9   :  { %2446 = vmatmul.msk.f32.vlgmr.msra.gmra.mxu2 %vm3452_vm6, %v2440_v26  ;;  %vm3455_vm7 = vmmov %vm3440_vm0 }
  0xca   :  { %2448 = vmatmul.msk.f32.vlgmr.msra.gmra.mxu3 %vm3453_vm13, %v2440_v26  ;;  %2459 = vmatpush.msk.msra.mxu0 %vm3455_vm7, %v1096_v39  ;;  %vm3456_vm8 = vmmov %vm3440_vm0  ;;  %vm3457_vm0 = vcmp.lt.s32.totalorder %v2665_v40, 112 }
  0xcb   :  { %2451 = vmatmul.msk.f32.vlgmr.msrb.gmra.mxu0 %vm3446_vm5, %v2449_v38  ;;  %2461 = vmatpush.msk.msra.mxu1 %vm3456_vm8, %v1097_v41  ;;  %vm3458_vm3 = vmmov %vm3457_vm0 }
  0xcc   :  { %2453 = vmatmul.msk.f32.vlgmr.msrb.gmra.mxu1 %vm3454_vm14, %v2449_v38  ;;  %v953_v44 = vpop.permute.xlu0 %952  ;;  %vm3459_vm8 = vmmov %vm3455_vm7  ;;  %v1086_v57 = vpop.permute.xlu1 %1085 }
  0xcd   :  { %v956_v45 = vsel %vm3457_vm0, %v949_v14, %v953_v44  ;;  %v958_v47 = vsel %vm3458_vm3, %v953_v44, %v949_v14  ;;  %vm3460_vm14 = vmmov %vm3446_vm5  ;;  %vm3463_vm0 = vcmp.lt.s32.totalorder %v2665_v40, 111 }
  0xce   :  { %v965_v48 = vsel %vm2870_vm15, %v956_v45, 0.0  ;;  %v966_v55 = vsel %vm2878_vm9, %v958_v47, 0.0  ;;  %vm3461_vm6 = vmmov %vm3446_vm5 }
  0xcf   :  { %2454 = vmatpush.msk.msrb.mxu2 %vm3455_vm7, %v965_v48  ;;  %2456 = vmatpush.msk.msrb.mxu3 %vm3459_vm8, %v966_v55  ;;  %vm3462_vm13 = vmmov %vm3446_vm5 }
  0xd0   :  { %vm3464_vm3 = vmmov %vm3463_vm0 }
  0xd1   :  { %2455 = vmatmul.msk.f32.vlgmr.msrb.gmra.mxu2 %vm3460_vm14, %v2449_v38  ;;  %vm3465_vm8 = vmmov %vm3455_vm7 }
  0xd2   :  { %2457 = vmatmul.msk.f32.vlgmr.msrb.gmra.mxu3 %vm3461_vm6, %v2449_v38  ;;  %vm3466_vm14 = vmmov %vm3446_vm5 }
  0xd3   :  { %2460 = vmatmul.msk.f32.vlgmr.msra.gmra.mxu0 %vm3462_vm13, %v2458_v56  ;;  %vm3467_vm6 = vmmov %vm3446_vm5 }
  0xd4   :  { %2462 = vmatmul.msk.f32.vlgmr.msra.gmra.mxu1 %vm3446_vm5, %v2458_v56  ;;  %v1082_v58 = vpop.permute.xlu0 %1081  ;;  %vm3468_vm13 = vmmov %vm3455_vm7 }
  0xd5   :  { %v1089_v59 = vsel %vm3463_vm0, %v1082_v58, %v1086_v57  ;;  %v1091_v60 = vsel %vm3464_vm3, %v1086_v57, %v1082_v58  ;;  %vm3469_vm5 = vmmov %vm3455_vm7 }
  0xd6   :  { %v1098_v18 = vsel %vm2957_vm1, %v1089_v59, 0.0  ;;  %v1099_v19 = vsel %vm2965_vm2, %v1091_v60, 0.0  ;;  %vm3470_vm0 = vmmov %vm3469_vm5 }
  0xd7   :  { %2463 = vmatpush.msk.msra.mxu2 %vm3455_vm7, %v1098_v18  ;;  %2465 = vmatpush.msk.msra.mxu3 %vm3465_vm8, %v1099_v19  ;;  %vm3471_vm3 = vmmov %vm3470_vm0 }
  0xd8   :  { %vm3472_vm8 = vmmov %vm3470_vm0 }
  0xd9   :  { %2464 = vmatmul.msk.f32.vlgmr.msra.gmra.mxu2 %vm3466_vm14, %v2458_v56  ;;  %vm3473_vm14 = vmmov %vm3470_vm0 }
  0xda   :  { %2466 = vmatmul.msk.f32.vlgmr.msra.gmra.mxu3 %vm3467_vm6, %v2458_v56  ;;  %vm3474_vm6 = vmmov %vm3470_vm0 }
 0x10b   :  { %v185_v42 = vpop.f32.mrf.mxu2  ;;  %v205_v23 = vpop.f32.mrf.mxu3 }
 0x10d   :  { %v136_v61 = vpop.f32.mrf.mxu0  ;;  %v156_v62 = vpop.f32.mrf.mxu1 }
 0x10e   :  { %v186_v29 = vadd.f32 %v185_v42, %v136_v61  ;;  %v206_v31 = vadd.f32 %v205_v23, %v156_v62 }
 0x115   :  { %v231_v63 = vpop.f32.mrf.mxu0  ;;  %v251_v0 = vpop.f32.mrf.mxu1 }
 0x11c   :  { %v277_v4 = vpop.f32.mrf.mxu2  ;;  %v297_v5 = vpop.f32.mrf.mxu3 }
 0x11d   :  { %v360_v46 = vpop.f32.mrf.mxu0  ;;  %v380_v3 = vpop.f32.mrf.mxu1  ;;  %v278_v58 = vadd.f32 %v277_v4, %v231_v63  ;;  %v298_v59 = vadd.f32 %v297_v5, %v251_v0 }
 0x11e   :  { %v383_v32 = vadd.f32 %v360_v46, %v186_v29  ;;  %v384_v33 = vadd.f32 %v380_v3, %v206_v31 }
 0x124   :  { %v408_v8 = vpop.f32.mrf.mxu2  ;;  %v428_v9 = vpop.f32.mrf.mxu3 }
 0x125   :  { %v493_v6 = vpop.f32.mrf.mxu0  ;;  %v513_v7 = vpop.f32.mrf.mxu1  ;;  %v431_v23 = vadd.f32 %v408_v8, %v278_v58  ;;  %v432_v46 = vadd.f32 %v428_v9, %v298_v59 }
 0x126   :  { %v516_v36 = vadd.f32 %v493_v6, %v383_v32  ;;  %v517_v37 = vadd.f32 %v513_v7, %v384_v33 }
 0x12e   :  { %v595_v10 = vpop.f32.mrf.mxu0  ;;  %v615_v14 = vpop.f32.mrf.mxu1 }
 0x12f   :  { %v618_v41 = vadd.f32 %v595_v10, %v516_v36  ;;  %v619_v44 = vadd.f32 %v615_v14, %v517_v37  ;;  %v2574_v37 = vmov 256.0  }
 0x130   :  { %2556 = vrcp.f32 %v2574_v37 }
 0x133   :  { %v541_v15 = vpop.f32.mrf.mxu2  ;;  %v561_v17 = vpop.f32.mrf.mxu3 }
 0x134   :  { %v564_v7 = vadd.f32 %v541_v15, %v431_v23  ;;  %v565_v10 = vadd.f32 %v561_v17, %v432_v46 }
 0x138   :  { %v729_v20 = vpop.f32.mrf.mxu0 }
 0x139   :  { %v749_v21 = vpop.f32.mrf.mxu1  ;;  %v752_v45 = vadd.f32 %v729_v20, %v618_v41 }
 0x13a   :  { %v753_v47 = vadd.f32 %v749_v21, %v619_v44 }
 0x13c   :  { %v644_v24 = vpop.f32.mrf.mxu2 }
 0x13d   :  { %v664_v25 = vpop.f32.mrf.mxu3 }
 0x13e   :  { %v668_v63 = vadd.f32 %v664_v25, %v565_v10 }
 0x140   :  { %v862_v26 = vpop.f32.mrf.mxu0 }
 0x141   :  { %v882_v27 = vpop.f32.mrf.mxu1  ;;  %v885_v48 = vadd.f32 %v862_v26, %v752_v45  ;;  %v667_v26 = vadd.f32 %v644_v24, %v564_v7  ;;  %v2557_v24 = vpop.eup %2556 }
 0x142   :  { %v886_v55 = vadd.f32 %v882_v27, %v753_v47  ;;  %v1212_v25 = vmul.f32 256.0, %v2557_v24  ;;  %vm1216_vm7 = vweird.f32 %v2557_v24 }
 0x144   :  { %v777_v34 = vpop.f32.mrf.mxu2 }
 0x145   :  { %v797_v35 = vpop.f32.mrf.mxu3  ;;  %v800_v0 = vadd.f32 %v777_v34, %v667_v26  ;;  %v1213_v34 = vsub.f32 1.0, %v1212_v25 }
 0x146   :  { %v801_v4 = vadd.f32 %v797_v35, %v668_v63 }
 0x147   :  { %v1214_v35 = vmul.f32 %v2557_v24, %v1213_v34 }
 0x148   :  { %v995_v38 = vpop.f32.mrf.mxu0 }
 0x149   :  { %v1015_v39 = vpop.f32.mrf.mxu1  ;;  %v1018_v60 = vadd.f32 %v995_v38, %v885_v48  ;;  %v1215_v38 = vadd.f32 %v2557_v24, %v1214_v35 }
 0x14a   :  { %v1019_v18 = vadd.f32 %v1015_v39, %v886_v55 }
 0x14b   :  { %v3029_v39 = vsel %vm1216_vm7, %v2557_v24, %v1215_v38 }
 0x14c   :  { %v910_v56 = vpop.f32.mrf.mxu2 }
 0x14d   :  { %v930_v57 = vpop.f32.mrf.mxu3  ;;  %v933_v5 = vadd.f32 %v910_v56, %v800_v0 }
 0x14e   :  { %v934_v27 = vadd.f32 %v930_v57, %v801_v4 }
 0x150   :  { %v1128_v19 = vpop.f32.mrf.mxu0 }
 0x151   :  { %v1148_v61 = vpop.f32.mrf.mxu1  ;;  %v1151_v62 = vadd.f32 %v1128_v19, %v1018_v60 }
 0x152   :  { %v1152_v42 = vadd.f32 %v1148_v61, %v1019_v18 }
 0x153   :  { %v1201_v3 = vsel %vm3468_vm13, %v1151_v62, 0.0  ;;  %vm3475_vm13 = vmmov %vm3470_vm0 }
 0x154   :  { %v1202_v6 = vsel %vm3469_vm5, %v1152_v42, 0.0  ;;  %v1043_v20 = vpop.f32.mrf.mxu2 }
 0x155   :  { %v1203_v14 = vadd.f32 %v1202_v6, %v1201_v3  ;;  %v1063_v21 = vpop.f32.mrf.mxu3  ;;  %v1066_v29 = vadd.f32 %v1043_v20, %v933_v5 }
 0x156   :  { %v1067_v31 = vadd.f32 %v1063_v21, %v934_v27 }
 0x157   :  { %1204 = vadd.xlane.f32.xlu2 %v1203_v14 }
 0x15c   :  { %v1176_v8 = vpop.f32.mrf.mxu2 }
 0x15d   :  { %v1196_v9 = vpop.f32.mrf.mxu3  ;;  %v1199_v32 = vadd.f32 %v1176_v8, %v1066_v29 }
 0x15e   :  { %v1200_v33 = vadd.f32 %v1196_v9, %v1067_v31 }
 0x15f   :  { %v1206_v36 = vsel %vm3470_vm0, %v1199_v32, 0.0 }
 0x160   :  { %v1207_v15 = vsel %vm3471_vm3, %v1200_v33, 0.0 }
 0x161   :  { %v1208_v17 = vadd.f32 %v1207_v15, %v1206_v36 }
 0x163   :  { %1209 = vadd.xlane.f32.xlu0 %v1208_v17 }
 0x1ca   :  { %v1205_v41 = vpop.xlane.xlu2 %1204 }
 0x1cb   :  { %v1218_v44 = vmul.f32 %v3029_v39, %v1205_v41 }
 0x1cd   :  { %v1220_v45 = vsub.f32 %v1151_v62, %v1218_v44  ;;  %v1221_v47 = vsub.f32 %v1152_v42, %v1218_v44 }
 0x1cf   :  { %v1224_v48 = vmul.f32 %v1220_v45, %v1220_v45  ;;  %v1225_v55 = vmul.f32 %v1221_v47, %v1221_v47 }
 0x1d1   :  { %v1228_v56 = vsel %vm3472_vm8, %v1224_v48, 0.0  ;;  %v1229_v57 = vsel %vm3473_vm14, %v1225_v55, 0.0 }
 0x1d2   :  { %v1230_v58 = vadd.f32 %v1229_v57, %v1228_v56 }
 0x1d4   :  { %1231 = vadd.xlane.f32.xlu1 %v1230_v58 }
 0x1d6   :  { %v1210_v59 = vpop.xlane.xlu0 %1209 }
 0x1d7   :  { %v1219_v60 = vmul.f32 %v3029_v39, %v1210_v59 }
 0x1d9   :  { %v1222_v18 = vsub.f32 %v1199_v32, %v1219_v60  ;;  %v1223_v19 = vsub.f32 %v1200_v33, %v1219_v60 }
 0x1db   :  { %v1226_v61 = vmul.f32 %v1222_v18, %v1222_v18  ;;  %v1227_v23 = vmul.f32 %v1223_v19, %v1223_v19 }
 0x1dd   :  { %v1233_v46 = vsel %vm3474_vm6, %v1226_v61, 0.0  ;;  %v1234_v62 = vsel %vm3475_vm13, %v1227_v23, 0.0  ;;  %vm3476_vm6 = vcmp.lt.s32.totalorder %v2665_v40, 17 }
 0x1de   :  { %v1235_v42 = vadd.f32 %v1234_v62, %v1233_v46  ;;  %vm3477_vm13 = vmmov %vm3476_vm6 }
 0x1e0   :  { %1236 = vadd.xlane.f32.xlu2 %v1235_v42 }
 0x247   :  { %v1232_v3 = vpop.xlane.xlu1 %1231 }
 0x248   :  { %v1238_v6 = vmul.f32 %v1232_v3, %v3029_v39 }
 0x24a   :  { %v1240_v7 = vadd.f32 1e-05, %v1238_v6 }
 0x24c   :  { %2558 = vrsqrt.f32 %v1240_v7  ;;  %vm1248_vm8 = vweird.f32 %v1240_v7 }
 0x252   :  { %v2559_v20 = vpop.eup %2558 }
 0x253   :  { %v1237_v10 = vpop.xlane.xlu2 %1236  ;;  %v1243_v26 = vmul.f32 %v2559_v20, %v1240_v7  ;;  %vm1249_vm7 = vweird.f32 %v2559_v20 }
 0x254   :  { %v1239_v14 = vmul.f32 %v1237_v10, %v3029_v39  ;;  %vm1250_vm14 = vmor %vm1248_vm8, %vm1249_vm7  ;;  %vm3481_vm7 = vcmask 1043456  }
 0x255   :  { %v1244_v63 = vmul.f32 %v2559_v20, %v1243_v26  ;;  %vm3482_vm8 = vmmov %vm3481_vm7 }
 0x256   :  { %v1241_v21 = vadd.f32 1e-05, %v1239_v14  ;;  %v2467_v14 = vld [vmem:[%s3372_s2 + $0x4] sm:$0xf] }
 0x257   :  { %v1245_v5 = vmul.f32 0.5, %v1244_v63 }
 0x258   :  { %2560 = vrsqrt.f32 %v1241_v21  ;;  %vm1258_vm0 = vweird.f32 %v1241_v21 }
 0x259   :  { %v1246_v31 = vsub.f32 1.5, %v1245_v5 }
 0x25b   :  { %v1247_v32 = vmul.f32 %v2559_v20, %v1246_v31 }
 0x25d   :  { %v1251_v24 = vsel %vm1250_vm14, %v2559_v20, %v1247_v32  ;;  %vm3483_vm14 = vcmask 31744  }
 0x25e   :  { %v2561_v0 = vpop.eup %2560  ;;  %v1262_v25 = vmul.f32 %v1251_v24, %v1220_v45  ;;  %v1263_v34 = vmul.f32 %v1251_v24, %v1221_v47 }
 0x25f   :  { %v1253_v4 = vmul.f32 %v2561_v0, %v1241_v21  ;;  %vm1259_vm5 = vweird.f32 %v2561_v0 }
 0x260   :  { %vm1260_vm3 = vmor %vm1258_vm0, %vm1259_vm5  ;;  %v3049_v35 = vmax.f32 %v1262_v25, 0.0  ;;  %v3051_v38 = vmax.f32 %v1263_v34, 0.0 }
 0x261   :  { %v1254_v27 = vmul.f32 %v2561_v0, %v1253_v4  ;;  %vm3478_vm5 = vmmov %vm3476_vm6 }
 0x262   :  { %vm3479_vm0 = vmmov %vm3478_vm5 }
 0x263   :  { %v1255_v29 = vmul.f32 0.5, %v1254_v27 }
 0x265   :  { %v1256_v8 = vsub.f32 1.5, %v1255_v29 }
 0x267   :  { %v1257_v9 = vmul.f32 %v2561_v0, %v1256_v8 }
 0x269   :  { %v1261_v33 = vsel %vm1260_vm3, %v2561_v0, %v1257_v9  ;;  %vm3480_vm3 = vnez %v3412_v54 }
 0x26a   :  { %v1264_v36 = vmul.f32 %v1261_v33, %v1222_v18  ;;  %v1265_v15 = vmul.f32 %v1261_v33, %v1223_v19  ;;  %v1286_v19 = vld [vmem:[%s3372_s2] sm:$0xf]  ;;  %v2484_v33 = vld [vmem:[%s3372_s2 + $0x8] sm:$0xf] }
 0x26c   :  { %v3039_v17 = vmax.f32 %v1264_v36, 0.0  ;;  %v3041_v37 = vmax.f32 %v1265_v15, 0.0 }
 0x26e   :  { %1276 = vrot.lane.b32.xlu1 %v3041_v37, %s2566_s16  ;;  %1289 = vrot.lane.b32.xlu0 %v3039_v17, %s2567_s0 }
 0x26f   :  { %1272 = vrot.lane.b32.xlu2 %v3039_v17, %s2566_s16 }
 0x276   :  { %1287 = vrot.lane.b32.xlu1 %v3049_v35, %s2567_s0  ;;  %1274 = vrot.lane.b32.xlu0 %v3051_v38, %s2566_s16 }
 0x277   :  { %1270 = vrot.lane.b32.xlu2 %v3049_v35, %s2566_s16 }
 0x27e   :  { %1497 = vrot.lane.b32.xlu1 %v3039_v17, %s2568_s17  ;;  %1291 = vrot.lane.b32.xlu0 %v3051_v38, %s2567_s0 }
 0x27f   :  { %1293 = vrot.lane.b32.xlu2 %v3041_v37, %s2567_s0 }
 0x286   :  { %1499 = vrot.lane.b32.xlu1 %v3051_v38, %s2568_s17  ;;  %1501 = vrot.lane.b32.xlu0 %v3041_v37, %s2568_s17 }
 0x287   :  { %1618 = vrot.lane.b32.xlu2 %v3041_v37, %s2569_s18 }
 0x28e   :  { %1612 = vrot.lane.b32.xlu1 %v3049_v35, %s2569_s18  ;;  %1614 = vrot.lane.b32.xlu0 %v3039_v17, %s2569_s18 }
 0x28f   :  { %1495 = vrot.lane.b32.xlu2 %v3049_v35, %s2568_s17 }
 0x296   :  { %1836 = vrot.lane.b32.xlu1 %v3041_v37, %s2570_s19  ;;  %1616 = vrot.lane.b32.xlu0 %v3051_v38, %s2569_s18 }
 0x297   :  { %1832 = vrot.lane.b32.xlu2 %v3039_v17, %s2570_s19 }
 0x29e   :  { %1949 = vrot.lane.b32.xlu1 %v3039_v17, %s2571_s20  ;;  %1953 = vrot.lane.b32.xlu0 %v3041_v37, %s2571_s20 }
 0x29f   :  { %2070 = vrot.lane.b32.xlu2 %v3041_v37, %s2572_s21 }
 0x2a6   :  { %1951 = vrot.lane.b32.xlu1 %v3051_v38, %s2571_s20  ;;  %1830 = vrot.lane.b32.xlu0 %v3049_v35, %s2570_s19 }
 0x2a7   :  { %1834 = vrot.lane.b32.xlu2 %v3051_v38, %s2570_s19 }
 0x2ae   :  { %2064 = vrot.lane.b32.xlu1 %v3049_v35, %s2572_s21  ;;  %2066 = vrot.lane.b32.xlu0 %v3039_v17, %s2572_s21 }
 0x2af   :  { %1947 = vrot.lane.b32.xlu2 %v3049_v35, %s2571_s20 }
 0x2b6   :  { %2187 = vrot.lane.b32.xlu1 %v3041_v37, %s2573_s22  ;;  %2068 = vrot.lane.b32.xlu0 %v3051_v38, %s2572_s21 }
 0x2b7   :  { %2183 = vrot.lane.b32.xlu2 %v3039_v17, %s2573_s22 }
 0x2be   :  { %2181 = vrot.lane.b32.xlu0 %v3049_v35, %s2573_s22 }
 0x2bf   :  { %2185 = vrot.lane.b32.xlu2 %v3051_v38, %s2573_s22 }
 0x2c9   :  { %v1273_v41 = vpop.permute.xlu2 %1272 }
 0x2d1   :  { %v1271_v44 = vpop.permute.xlu2 %1270 }
 0x2d9   :  { %v1294_v45 = vpop.permute.xlu2 %1293 }
 0x2e0   :  { %v1277_v47 = vpop.permute.xlu1 %1276  ;;  %v1290_v48 = vpop.permute.xlu0 %1289 }
 0x2e1   :  { %v3111_v55 = vpop.permute.xlu2 %1618  ;;  %v1279_v58 = vsel %vm3476_vm6, %v1273_v41, %v1277_v47  ;;  %v1281_v59 = vsel %vm3477_vm13, %v1277_v47, %v1273_v41  ;;  %vm3484_vm6 = vmmov %vm3483_vm14  ;;  %v2493_v41 = vld [vmem:[%s3372_s2 + $0xc] sm:$0xf] }
 0x2e2   :  { %v1284_v46 = vsel %vm2700_vm4, %v1281_v59, 0.0  ;;  %v1285_v62 = vsel %vm3480_vm3, %v1279_v58, 0.0  ;;  %vm3485_vm13 = vmmov %vm3481_vm7  ;;  %v2502_v59 = vld [vmem:[%s3372_s2 + $0x10] sm:$0xf] }
 0x2e8   :  { %v1288_v56 = vpop.permute.xlu1 %1287  ;;  %v1275_v57 = vpop.permute.xlu0 %1274 }
 0x2e9   :  { %v1278_v60 = vsel %vm3478_vm5, %v1271_v44, %v1275_v57  ;;  %v1280_v18 = vsel %vm3479_vm0, %v1275_v57, %v1271_v44  ;;  %vm3486_vm5 = vmmov %vm3481_vm7  ;;  %v1496_v42 = vpop.permute.xlu2 %1495  ;;  %vm3487_vm0 = vcmp.lt.s32.totalorder %v2665_v40, 16 }
 0x2ea   :  { %v1282_v61 = vsel %vm2700_vm4, %v1280_v18, 0.0  ;;  %v1283_v23 = vsel %vm3480_vm3, %v1278_v60, 0.0  ;;  %v1296_v7 = vsel %vm3487_vm0, %v1290_v48, %v1294_v45  ;;  %vm3489_vm4 = vmmov %vm3487_vm0 }
 0x2eb   :  { %2472 = vmatpush.msk.msrb.mxu2 %vm3481_vm7, %v1282_v61  ;;  %2474 = vmatpush.msk.msrb.mxu3 %vm3482_vm8, %v1283_v23  ;;  %vm3488_vm7 = vmmov %vm3487_vm0  ;;  %vm3491_vm8 = vnez %v3402_v49 }
 0x2ec   :  { %2473 = vmatmul.msk.f32.vlgmr.msrb.gmra.mxu2 %vm3483_vm14, %v1286_v19  ;;  %2475 = vmatmul.msk.f32.vlgmr.msrb.gmra.mxu3 %vm3484_vm6, %v1286_v19  ;;  %v1298_v53 = vsel %vm3488_vm7, %v1294_v45, %v1290_v48  ;;  %vm3490_vm3 = vmmov %vm3487_vm0  ;;  %vm3492_vm14 = vnez %v3406_v51 }
 0x2ed   :  { %2480 = vmatpush.msk.msra.mxu2 %vm3485_vm13, %v1284_v46  ;;  %2482 = vmatpush.msk.msra.mxu3 %vm3486_vm5, %v1285_v62  ;;  %vm3493_vm6 = vmmov %vm3486_vm5  ;;  %v1301_v26 = vsel %vm3491_vm8, %v1298_v53, 0.0  ;;  %v1302_v63 = vsel %vm3492_vm14, %v1296_v7, 0.0 }
 0x2ee   :  { %vm3494_vm13 = vmmov %vm3486_vm5  ;;  %vm3495_vm5 = vcmask 31744  }
 0x2ef   :  { %vm3496_vm0 = vmmov %vm3495_vm5 }
 0x2f0   :  { %v1498_v3 = vpop.permute.xlu1 %1497  ;;  %v1292_v6 = vpop.permute.xlu0 %1291  ;;  %vm3497_vm7 = vmmov %vm3493_vm6 }
 0x2f1   :  { %v1295_v54 = vsel %vm3489_vm4, %v1288_v56, %v1292_v6  ;;  %v1297_v10 = vsel %vm3490_vm3, %v1292_v6, %v1288_v56  ;;  %vm3498_vm4 = vmmov %vm3493_vm6  ;;  %v1833_v5 = vpop.permute.xlu2 %1832 }
 0x2f2   :  { %v1299_v20 = vsel %vm3491_vm8, %v1297_v10, 0.0  ;;  %v1300_v21 = vsel %vm3492_vm14, %v1295_v54, 0.0  ;;  %vm3499_vm3 = vmmov %vm3496_vm0  ;;  %vm3501_vm8 = vcmp.lt.s32.totalorder %v2665_v40, 15 }
 0x2f3   :  { %2468 = vmatpush.msk.msrb.mxu0 %vm3493_vm6, %v1299_v20  ;;  %2470 = vmatpush.msk.msrb.mxu1 %vm3494_vm13, %v1300_v21  ;;  %vm3500_vm2 = vmmov %vm3496_vm0 }
 0x2f4   :  { %2469 = vmatmul.msk.f32.vlgmr.msrb.gmra.mxu0 %vm3495_vm5, %v2467_v14  ;;  %2471 = vmatmul.msk.f32.vlgmr.msrb.gmra.mxu1 %vm3496_vm0, %v2467_v14  ;;  %vm3502_vm14 = vmmov %vm3501_vm8  ;;  %vm3505_vm5 = vnez %v3418_v13 }
 0x2f5   :  { %2476 = vmatpush.msk.msra.mxu0 %vm3497_vm7, %v1301_v26  ;;  %2478 = vmatpush.msk.msra.mxu1 %vm3498_vm4, %v1302_v63  ;;  %vm3503_vm6 = vmmov %vm3501_vm8  ;;  %v2529_v63 = vld [vmem:[%s3372_s2 + $0x1c] sm:$0xf] }
 0x2f6   :  { %2481 = vmatmul.msk.f32.vlgmr.msra.gmra.mxu2 %vm3499_vm3, %v1286_v19  ;;  %2483 = vmatmul.msk.f32.vlgmr.msra.gmra.mxu3 %vm3500_vm2, %v1286_v19  ;;  %vm3504_vm13 = vmmov %vm3503_vm6  ;;  %vm3506_vm2 = vnez %v3420_v16 }
 0x2f7   :  { %vm3507_vm0 = vmmov %vm3498_vm4 }
 0x2f8   :  { %v1500_v0 = vpop.permute.xlu1 %1499  ;;  %v1502_v4 = vpop.permute.xlu0 %1501  ;;  %vm3508_vm7 = vmmov %vm3507_vm0 }
 0x2f9   :  { %v1503_v49 = vsel %vm3501_vm8, %v1496_v42, %v1500_v0  ;;  %v1505_v51 = vsel %vm3502_vm14, %v1500_v0, %v1496_v42  ;;  %v1504_v27 = vsel %vm3503_vm6, %v1498_v3, %v1502_v4  ;;  %v1506_v29 = vsel %vm3504_vm13, %v1502_v4, %v1498_v3  ;;  %vm3509_vm4 = vmmov %vm3507_vm0  ;;  %v3202_v34 = vpop.permute.xlu2 %2070 }
 0x2fa   :  { %v1507_v31 = vsel %vm3505_vm5, %v1505_v51, 0.0  ;;  %v1508_v8 = vsel %vm3506_vm2, %v1503_v49, 0.0  ;;  %v1509_v9 = vsel %vm3505_vm5, %v1506_v29, 0.0  ;;  %v1510_v32 = vsel %vm3506_vm2, %v1504_v27, 0.0  ;;  %vm3510_vm3 = vmmov %vm3507_vm0 }
 0x2fb   :  { %2485 = vmatpush.msk.msrb.mxu0 %vm3507_vm0, %v1507_v31  ;;  %2487 = vmatpush.msk.msrb.mxu1 %vm3508_vm7, %v1508_v8  ;;  %vm3511_vm8 = vcmask 31744   ;;  %vm3515_vm5 = vcmp.lt.s32.totalorder %v2665_v40, 1  ;;  %vm3517_vm0 = vnez %v3404_v50  ;;  %vm3518_vm7 = vnez %v3408_v52 }
 0x2fc   :  { %2489 = vmatpush.msk.msrb.mxu2 %vm3509_vm4, %v1509_v9  ;;  %2491 = vmatpush.msk.msrb.mxu3 %vm3510_vm3, %v1510_v32  ;;  %vm3512_vm14 = vmmov %vm3511_vm8 }
 0x2fd   :  { %2477 = vmatmul.msk.f32.vlgmr.msra.gmra.mxu0 %vm3511_vm8, %v2467_v14  ;;  %2479 = vmatmul.msk.f32.vlgmr.msra.gmra.mxu1 %vm3512_vm14, %v2467_v14  ;;  %vm3513_vm6 = vmmov %vm3511_vm8 }
 0x2fe   :  { %2490 = vmatmul.msk.f32.vlgmr.msrb.gmra.mxu2 %vm3513_vm6, %v2484_v33  ;;  %vm3514_vm13 = vmmov %vm3513_vm6 }
 0x2ff   :  { %2492 = vmatmul.msk.f32.vlgmr.msrb.gmra.mxu3 %vm3514_vm13, %v2484_v33  ;;  %vm3516_vm2 = vmmov %vm3515_vm5 }
 0x300   :  { %v1613_v13 = vpop.permute.xlu1 %1612  ;;  %v1615_v16 = vpop.permute.xlu0 %1614  ;;  %vm3519_vm4 = vmmov %vm3510_vm3 }
 0x301   :  { %v1621_v36 = vsel %vm3515_vm5, %v1615_v16, %v3111_v55  ;;  %v1623_v15 = vsel %vm3516_vm2, %v3111_v55, %v1615_v16  ;;  %vm3520_vm8 = vmmov %vm3510_vm3  ;;  %v1835_v60 = vpop.permute.xlu2 %1834 }
 0x302   :  { %v1626_v24 = vsel %vm3517_vm0, %v1623_v15, 0.0  ;;  %v1627_v25 = vsel %vm3518_vm7, %v1621_v36, 0.0  ;;  %vm3521_vm14 = vmmov %vm3510_vm3 }
 0x303   :  { %2498 = vmatpush.msk.msra.mxu2 %vm3519_vm4, %v1626_v24  ;;  %2500 = vmatpush.msk.msra.mxu3 %vm3510_vm3, %v1627_v25  ;;  %vm3522_vm13 = vmmov %vm3513_vm6  ;;  %vm3525_vm4 = vcmp.lt.s32.totalorder %v2665_v40, 127 }
 0x304   :  { %vm3523_vm5 = vmmov %vm3513_vm6 }
 0x305   :  { %2507 = vmatpush.msk.msrb.mxu2 %vm3520_vm8, %v3039_v17  ;;  %2509 = vmatpush.msk.msrb.mxu3 %vm3521_vm14, %v3041_v37  ;;  %vm3524_vm2 = vmmov %vm3523_vm5  ;;  %vm3527_vm8 = vcmp.lt.s32.totalorder %v2665_v40, 1 }
 0x306   :  { %2486 = vmatmul.msk.f32.vlgmr.msrb.gmra.mxu0 %vm3513_vm6, %v2484_v33  ;;  %2488 = vmatmul.msk.f32.vlgmr.msrb.gmra.mxu1 %vm3522_vm13, %v2484_v33  ;;  %vm3526_vm3 = vmmov %vm3525_vm4  ;;  %vm3529_vm6 = vcmask 1043456   ;;  %v2538_v33 = vld [vmem:[%s3372_s2 + $0x20] sm:$0xf] }
 0x307   :  { %2499 = vmatmul.msk.f32.vlgmr.msra.gmra.mxu2 %vm3523_vm5, %v2493_v41  ;;  %2501 = vmatmul.msk.f32.vlgmr.msra.gmra.mxu3 %vm3524_vm2, %v2493_v41  ;;  %vm3528_vm14 = vmmov %vm3527_vm8 }
 0x308   :  { %v1837_v44 = vpop.permute.xlu1 %1836  ;;  %v1617_v45 = vpop.permute.xlu0 %1616  ;;  %vm3530_vm13 = vmmov %vm3529_vm6 }
 0x309   :  { %v1839_v47 = vsel %vm3525_vm4, %v1833_v5, %v1837_v44  ;;  %v1841_v48 = vsel %vm3526_vm3, %v1837_v44, %v1833_v5  ;;  %v1620_v17 = vsel %vm3527_vm8, %v1613_v13, %v1617_v45  ;;  %v1622_v37 = vsel %vm3528_vm14, %v1617_v45, %v1613_v13  ;;  %vm3531_vm5 = vmmov %vm3529_vm6  ;;  %v1948_v23 = vpop.permute.xlu2 %1947 }
 0x30a   :  { %v1844_v55 = vsel %vm2752_vm10, %v1839_v47, 0.0  ;;  %v1845_v56 = vsel %vm2758_vm11, %v1841_v48, 0.0  ;;  %v1624_v57 = vsel %vm3517_vm0, %v1622_v37, 0.0  ;;  %v1625_v58 = vsel %vm3518_vm7, %v1620_v17, 0.0  ;;  %vm3532_vm2 = vmmov %vm3531_vm5 }
 0x30b   :  { %2494 = vmatpush.msk.msra.mxu0 %vm3529_vm6, %v1624_v57  ;;  %2496 = vmatpush.msk.msra.mxu1 %vm3530_vm13, %v1625_v58  ;;  %vm3533_vm4 = vcmask 31744   ;;  %vm3535_vm0 = vmmov %vm3532_vm2  ;;  %vm3539_vm6 = vcmp.lt.s32.totalorder %v2665_v40, 113 }
 0x30c   :  { %2516 = vmatpush.msk.msra.mxu2 %vm3531_vm5, %v1844_v55  ;;  %2518 = vmatpush.msk.msra.mxu3 %vm3532_vm2, %v1845_v56  ;;  %vm3534_vm3 = vmmov %vm3533_vm4  ;;  %vm3541_vm5 = vnez %v3428_v22 }
 0x30d   :  { %2503 = vmatpush.msk.msrb.mxu0 %vm3535_vm0, %v3049_v35  ;;  %vm3536_vm7 = vmmov %vm3535_vm0 }
 0x30e   :  { %2495 = vmatmul.msk.f32.vlgmr.msra.gmra.mxu0 %vm3533_vm4, %v2493_v41  ;;  %2497 = vmatmul.msk.f32.vlgmr.msra.gmra.mxu1 %vm3534_vm3, %v2493_v41  ;;  %vm3537_vm8 = vmmov %vm3534_vm3 }
 0x30f   :  { %2505 = vmatpush.msk.msrb.mxu1 %vm3536_vm7, %v3051_v38  ;;  %2508 = vmatmul.msk.f32.vlgmr.msrb.gmra.mxu2 %vm3537_vm8, %v2502_v59  ;;  %vm3538_vm14 = vmmov %vm3534_vm3  ;;  %v2511_v38 = vld [vmem:[%s3372_s2 + $0x14] sm:$0xf] }
 0x310   :  { %2510 = vmatmul.msk.f32.vlgmr.msrb.gmra.mxu3 %vm3538_vm14, %v2502_v59  ;;  %v1950_v50 = vpop.permute.xlu1 %1949  ;;  %v1954_v52 = vpop.permute.xlu0 %1953  ;;  %vm3540_vm13 = vmmov %vm3539_vm6 }
 0x311   :  { %v1956_v18 = vsel %vm3539_vm6, %v1950_v50, %v1954_v52  ;;  %v1958_v19 = vsel %vm3540_vm13, %v1954_v52, %v1950_v50  ;;  %vm3542_vm2 = vmmov %vm3535_vm0  ;;  %vm3548_vm13 = vcmp.lt.s32.totalorder %v2665_v40, 127  ;;  %v2184_v0 = vpop.permute.xlu2 %2183 }
 0x312   :  { %v1961_v61 = vsel %vm2891_vm12, %v1956_v18, 0.0  ;;  %v1962_v35 = vsel %vm3541_vm5, %v1958_v19, 0.0  ;;  %vm3543_vm4 = vmmov %vm3535_vm0 }
 0x313   :  { %2525 = vmatpush.msk.msrb.mxu2 %vm3542_vm2, %v1961_v61  ;;  %2527 = vmatpush.msk.msrb.mxu3 %vm3543_vm4, %v1962_v35  ;;  %vm3544_vm0 = vmmov %vm3534_vm3 }
 0x314   :  { %vm3545_vm7 = vmmov %vm3544_vm0 }
 0x315   :  { %vm3546_vm8 = vmmov %vm3544_vm0 }
 0x316   :  { %2504 = vmatmul.msk.f32.vlgmr.msrb.gmra.mxu0 %vm3534_vm3, %v2502_v59  ;;  %2506 = vmatmul.msk.f32.vlgmr.msrb.gmra.mxu1 %vm3544_vm0, %v2502_v59  ;;  %vm3547_vm14 = vmmov %vm3539_vm6 }
 0x317   :  { %2517 = vmatmul.msk.f32.vlgmr.msra.gmra.mxu2 %vm3545_vm7, %v2511_v38  ;;  %vm3549_vm2 = vmmov %vm3548_vm13 }
 0x318   :  { %2519 = vmatmul.msk.f32.vlgmr.msra.gmra.mxu3 %vm3546_vm8, %v2511_v38  ;;  %v1952_v46 = vpop.permute.xlu1 %1951  ;;  %v1831_v62 = vpop.permute.xlu0 %1830  ;;  %vm3550_vm3 = vmmov %vm3543_vm4 }
 0x319   :  { %v1955_v42 = vsel %vm3547_vm14, %v1948_v23, %v1952_v46  ;;  %v1957_v3 = vsel %vm3539_vm6, %v1952_v46, %v1948_v23  ;;  %v1838_v6 = vsel %vm3548_vm13, %v1831_v62, %v1835_v60  ;;  %v1840_v7 = vsel %vm3549_vm2, %v1835_v60, %v1831_v62  ;;  %vm3551_vm0 = vmmov %vm3550_vm3  ;;  %v2186_v1 = vpop.permute.xlu2 %2185 }
 0x31a   :  { %v1959_v53 = vsel %vm2891_vm12, %v1955_v42, 0.0  ;;  %v1960_v54 = vsel %vm3541_vm5, %v1957_v3, 0.0  ;;  %v1842_v10 = vsel %vm2752_vm10, %v1838_v6, 0.0  ;;  %v1843_v14 = vsel %vm2758_vm11, %v1840_v7, 0.0  ;;  %vm3552_vm7 = vmmov %vm3551_vm0 }
 0x31b   :  { %2512 = vmatpush.msk.msra.mxu0 %vm3543_vm4, %v1842_v10  ;;  %2514 = vmatpush.msk.msra.mxu1 %vm3550_vm3, %v1843_v14  ;;  %vm3553_vm12 = vmmov %vm3546_vm8  ;;  %vm3557_vm11 = vcmp.lt.s32.totalorder %v2665_v40, 112 }
 0x31c   :  { %vm3554_vm5 = vmmov %vm3546_vm8 }
 0x31d   :  { %2521 = vmatpush.msk.msrb.mxu0 %vm3551_vm0, %v1959_v53  ;;  %2523 = vmatpush.msk.msrb.mxu1 %vm3552_vm7, %v1960_v54  ;;  %vm3555_vm10 = vmmov %vm3554_vm5  ;;  %vm3565_vm7 = vcmp.lt.s32.totalorder %v2665_v40, 111 }
 0x31e   :  { %2513 = vmatmul.msk.f32.vlgmr.msra.gmra.mxu0 %vm3553_vm12, %v2511_v38  ;;  %2515 = vmatmul.msk.f32.vlgmr.msra.gmra.mxu1 %vm3554_vm5, %v2511_v38  ;;  %vm3556_vm8 = vmmov %vm3554_vm5 }
 0x31f   :  { %2526 = vmatmul.msk.f32.vlgmr.msrb.gmra.mxu2 %vm3555_vm10, %v2520_v43  ;;  %vm3558_vm14 = vmmov %vm3557_vm11 }
 0x320   :  { %2528 = vmatmul.msk.f32.vlgmr.msrb.gmra.mxu3 %vm3556_vm8, %v2520_v43  ;;  %v2065_v11 = vpop.permute.xlu1 %2064  ;;  %v2067_v12 = vpop.permute.xlu0 %2066  ;;  %vm3559_vm6 = vmmov %vm3551_vm0  ;;  %vm3569_vm8 = vnez %v3450_v30 }
 0x321   :  { %v2073_v22 = vsel %vm3557_vm11, %v2067_v12, %v3202_v34  ;;  %v2075_v20 = vsel %vm3558_vm14, %v3202_v34, %v2067_v12  ;;  %vm3560_vm13 = vmmov %vm3551_vm0 }
 0x322   :  { %v2078_v21 = vsel %vm2870_vm15, %v2073_v22, 0.0  ;;  %v2079_v26 = vsel %vm2878_vm9, %v2075_v20, 0.0  ;;  %vm3561_vm2 = vmmov %vm3554_vm5 }
 0x323   :  { %2534 = vmatpush.msk.msra.mxu2 %vm3559_vm6, %v2078_v21  ;;  %2536 = vmatpush.msk.msra.mxu3 %vm3560_vm13, %v2079_v26  ;;  %vm3562_vm4 = vmmov %vm3561_vm2 }
 0x324   :  { %vm3563_vm3 = vmmov %vm3561_vm2 }
 0x325   :  { %vm3564_vm0 = vmmov %vm3561_vm2 }
 0x326   :  { %2522 = vmatmul.msk.f32.vlgmr.msrb.gmra.mxu0 %vm3561_vm2, %v2520_v43  ;;  %2524 = vmatmul.msk.f32.vlgmr.msrb.gmra.mxu1 %vm3562_vm4, %v2520_v43  ;;  %vm3566_vm12 = vmmov %vm3565_vm7 }
 0x327   :  { %2535 = vmatmul.msk.f32.vlgmr.msra.gmra.mxu2 %vm3563_vm3, %v2529_v63  ;;  %vm3567_vm5 = vmmov %vm3557_vm11 }
 0x328   :  { %2537 = vmatmul.msk.f32.vlgmr.msra.gmra.mxu3 %vm3564_vm0, %v2529_v63  ;;  %v2188_v4 = vpop.permute.xlu1 %2187  ;;  %v2069_v5 = vpop.permute.xlu0 %2068  ;;  %vm3568_vm10 = vmmov %vm3567_vm5 }
 0x329   :  { %v2190_v49 = vsel %vm3565_vm7, %v2184_v0, %v2188_v4  ;;  %v2192_v51 = vsel %vm3566_vm12, %v2188_v4, %v2184_v0  ;;  %v2072_v27 = vsel %vm3567_vm5, %v2065_v11, %v2069_v5  ;;  %v2074_v29 = vsel %vm3568_vm10, %v2069_v5, %v2065_v11  ;;  %vm3570_vm11 = vmmov %vm3559_vm6 }
 0x32a   :  { %v2195_v31 = vsel %vm2957_vm1, %v2190_v49, 0.0  ;;  %v2196_v8 = vsel %vm3569_vm8, %v2192_v51, 0.0  ;;  %v2076_v9 = vsel %vm2870_vm15, %v2072_v27, 0.0  ;;  %v2077_v32 = vsel %vm2878_vm9, %v2074_v29, 0.0  ;;  %vm3571_vm14 = vmmov %vm3559_vm6 }
 0x32b   :  { %2530 = vmatpush.msk.msra.mxu0 %vm3570_vm11, %v2076_v9  ;;  %2532 = vmatpush.msk.msra.mxu1 %vm3571_vm14, %v2077_v32  ;;  %vm3572_vm13 = vmmov %vm3559_vm6 }
 0x32c   :  { %2543 = vmatpush.msk.msrb.mxu2 %vm3559_vm6, %v2195_v31  ;;  %2545 = vmatpush.msk.msrb.mxu3 %vm3572_vm13, %v2196_v8  ;;  %vm3573_vm2 = vmmov %vm3564_vm0 }
 0x32d   :  { %vm3574_vm4 = vmmov %vm3564_vm0 }
 0x32e   :  { %2531 = vmatmul.msk.f32.vlgmr.msra.gmra.mxu0 %vm3573_vm2, %v2529_v63  ;;  %2533 = vmatmul.msk.f32.vlgmr.msra.gmra.mxu1 %vm3574_vm4, %v2529_v63  ;;  %vm3575_vm15 = vmmov %vm3564_vm0 }
 0x32f   :  { %2544 = vmatmul.msk.f32.vlgmr.msrb.gmra.mxu2 %vm3575_vm15, %v2538_v33  ;;  %vm3576_vm3 = vmmov %vm3564_vm0 }
 0x330   :  { %2546 = vmatmul.msk.f32.vlgmr.msrb.gmra.mxu3 %vm3576_vm3, %v2538_v33  ;;  %v2182_v2 = vpop.permute.xlu0 %2181  ;;  %vm3577_vm9 = vmmov %vm3565_vm7 }
 0x331   :  { %v2189_v13 = vsel %vm3577_vm9, %v2182_v2, %v2186_v1  ;;  %vm3578_vm0 = vmmov %vm3565_vm7 }
 0x332   :  { %v2191_v16 = vsel %vm3578_vm0, %v2186_v1, %v2182_v2  ;;  %v2193_v36 = vsel %vm2957_vm1, %v2189_v13, 0.0  ;;  %vm3579_vm7 = vmmov %vm3559_vm6 }
 0x333   :  { %v2194_v15 = vsel %vm3569_vm8, %v2191_v16, 0.0  ;;  %2539 = vmatpush.msk.msrb.mxu0 %vm3579_vm7, %v2193_v36  ;;  %vm3580_vm12 = vmmov %vm3559_vm6 }
 0x334   :  { %2541 = vmatpush.msk.msrb.mxu1 %vm3580_vm12, %v2194_v15  ;;  %vm3581_vm5 = vmmov %vm3573_vm2 }
 0x335   :  { %vm3582_vm10 = vmmov %vm3573_vm2 }
 0x336   :  { %2540 = vmatmul.msk.f32.vlgmr.msrb.gmra.mxu0 %vm3581_vm5, %v2538_v33  ;;  %2542 = vmatmul.msk.f32.vlgmr.msrb.gmra.mxu1 %vm3582_vm10, %v2538_v33  ;;  %vm3583_vm1 = vmmov %vm3559_vm6 }
 0x337   :  { %vm3584_vm8 = vmmov %vm3583_vm1 }
 0x338   :  { %vm3585_vm11 = vmmov %vm3583_vm1 }
 0x339   :  { %vm3586_vm14 = vmmov %vm3583_vm1 }
 0x33a   :  { %vm3587_vm6 = vmmov %vm3583_vm1 }
 0x33b   :  { %vm3588_vm13 = vmmov %vm3583_vm1 }
 0x33c   :  { %vm3589_vm2 = vmmov %vm3583_vm1 }
 0x33d   :  { %vm3590_vm4 = vmmov %vm3583_vm1 }
 0x33e   :  { %vm3591_vm5 = vmmov %vm3583_vm1 }
 0x33f   :  { %vm3592_vm10 = vmmov %vm3583_vm1 }
 0x36f   :  { %v1380_v24 = vpop.f32.mrf.mxu2  ;;  %v1400_v25 = vpop.f32.mrf.mxu3 }
 0x371   :  { %v1331_v34 = vpop.f32.mrf.mxu0  ;;  %v1351_v41 = vpop.f32.mrf.mxu1 }
 0x372   :  { %v1381_v3 = vadd.f32 %v1380_v24, %v1331_v34  ;;  %v1401_v6 = vadd.f32 %v1400_v25, %v1351_v41 }
 0x379   :  { %v1472_v40 = vpop.f32.mrf.mxu2  ;;  %v1492_v44 = vpop.f32.mrf.mxu3 }
 0x37a   :  { %v1426_v45 = vpop.f32.mrf.mxu0  ;;  %v1446_v28 = vpop.f32.mrf.mxu1 }
 0x37b   :  { %v1473_v62 = vadd.f32 %v1472_v40, %v1426_v45  ;;  %v1493_v42 = vadd.f32 %v1492_v44, %v1446_v28 }
 0x381   :  { %v1587_v47 = vpop.f32.mrf.mxu2 }
 0x382   :  { %v1607_v48 = vpop.f32.mrf.mxu3  ;;  %v1610_v7 = vadd.f32 %v1587_v47, %v1473_v62 }
 0x383   :  { %v1539_v30 = vpop.f32.mrf.mxu0  ;;  %v1559_v17 = vpop.f32.mrf.mxu1  ;;  %v1611_v53 = vadd.f32 %v1607_v48, %v1493_v42 }
 0x384   :  { %v1562_v54 = vadd.f32 %v1539_v30, %v1381_v3  ;;  %v1563_v10 = vadd.f32 %v1559_v17, %v1401_v6 }
 0x38a   :  { %v1704_v37 = vpop.f32.mrf.mxu2  ;;  %v1724_v55 = vpop.f32.mrf.mxu3 }
 0x38b   :  { %v1656_v56 = vpop.f32.mrf.mxu0  ;;  %v1676_v57 = vpop.f32.mrf.mxu1  ;;  %v1727_v14 = vadd.f32 %v1704_v37, %v1610_v7  ;;  %v1728_v43 = vadd.f32 %v1724_v55, %v1611_v53 }
 0x38c   :  { %v1679_v11 = vadd.f32 %v1656_v56, %v1562_v54  ;;  %v1680_v12 = vadd.f32 %v1676_v57, %v1563_v10 }
 0x392   :  { %v1805_v58 = vpop.f32.mrf.mxu2 }
 0x393   :  { %v1825_v59 = vpop.f32.mrf.mxu3  ;;  %v1757_v60 = vpop.f32.mrf.mxu0  ;;  %v1828_v21 = vadd.f32 %v1805_v58, %v1727_v14 }
 0x394   :  { %v1777_v50 = vpop.f32.mrf.mxu1  ;;  %v1829_v26 = vadd.f32 %v1825_v59, %v1728_v43  ;;  %v1780_v4 = vadd.f32 %v1757_v60, %v1679_v11 }
 0x395   :  { %v1781_v5 = vadd.f32 %v1777_v50, %v1680_v12 }
 0x39a   :  { %v1922_v52 = vpop.f32.mrf.mxu2 }
 0x39b   :  { %v1942_v18 = vpop.f32.mrf.mxu3  ;;  %v1874_v19 = vpop.f32.mrf.mxu0  ;;  %v1945_v49 = vadd.f32 %v1922_v52, %v1828_v21 }
 0x39c   :  { %v1894_v61 = vpop.f32.mrf.mxu1  ;;  %v1946_v51 = vadd.f32 %v1942_v18, %v1829_v26  ;;  %v1897_v27 = vadd.f32 %v1874_v19, %v1780_v4  ;;  %v2362_v4 = vld.sshfl [vmem:[#allocation1 + $0x18] sm:$0xff pattern:$0x75316420] }
 0x39d   :  { %v1898_v29 = vadd.f32 %v1894_v61, %v1781_v5 }
 0x3a2   :  { %v2039_v35 = vpop.f32.mrf.mxu2 }
 0x3a3   :  { %v2059_v38 = vpop.f32.mrf.mxu3  ;;  %v1991_v23 = vpop.f32.mrf.mxu0  ;;  %v2062_v31 = vadd.f32 %v2039_v35, %v1945_v49 }
 0x3a4   :  { %v2011_v46 = vpop.f32.mrf.mxu1  ;;  %v2063_v8 = vadd.f32 %v2059_v38, %v1946_v51  ;;  %v2014_v9 = vadd.f32 %v1991_v23, %v1897_v27  ;;  %v2358_v27 = vld.sshfl [vmem:[#allocation1 + $0x8] sm:$0xff pattern:$0x75316420] }
 0x3a5   :  { %v2015_v32 = vadd.f32 %v2011_v46, %v1898_v29 }
 0x3aa   :  { %v2156_v22 = vpop.f32.mrf.mxu2 }
 0x3ab   :  { %v2176_v20 = vpop.f32.mrf.mxu3  ;;  %v2108_v63 = vpop.f32.mrf.mxu0  ;;  %v2179_v33 = vadd.f32 %v2156_v22, %v2062_v31  ;;  %v2361_v31 = vld.sshfl [vmem:[#allocation1 + $0x10] sm:$0xff pattern:$0x75316420] }
 0x3ac   :  { %v2128_v0 = vpop.f32.mrf.mxu1  ;;  %v2180_v1 = vadd.f32 %v2176_v20, %v2063_v8  ;;  %v2131_v2 = vadd.f32 %v2108_v63, %v2014_v9 }
 0x3ad   :  { %v2132_v13 = vadd.f32 %v2128_v0, %v2015_v32 }
 0x3b2   :  { %v2273_v16 = vpop.f32.mrf.mxu2 }
 0x3b3   :  { %v2293_v36 = vpop.f32.mrf.mxu3  ;;  %v2296_v15 = vadd.f32 %v2273_v16, %v2179_v33  ;;  %v2225_v25 = vpop.f32.mrf.mxu0  ;;  %v2357_v33 = vld.sshfl [vmem:[#allocation1] sm:$0xff pattern:$0x75316420] }
 0x3b4   :  { %v2297_v24 = vadd.f32 %v2293_v36, %v2180_v1  ;;  %v2245_v34 = vpop.f32.mrf.mxu1  ;;  %v2248_v41 = vadd.f32 %v2225_v25, %v2131_v2 }
 0x3b5   :  { %v2249_v40 = vadd.f32 %v2245_v34, %v2132_v13  ;;  %v2303_v44 = vsel %vm3583_vm1, %v2296_v15, 0.0 }
 0x3b6   :  { %v2304_v45 = vsel %vm3584_vm8, %v2297_v24, 0.0  ;;  %v2298_v47 = vsel %vm3585_vm11, %v2248_v41, 0.0 }
 0x3b7   :  { %v2305_v28 = vadd.f32 %v2304_v45, %v2303_v44  ;;  %v2299_v48 = vsel %vm3586_vm14, %v2249_v40, 0.0 }
 0x3b8   :  { %v2300_v30 = vadd.f32 %v2299_v48, %v2298_v47 }
 0x3b9   :  { %2306 = vadd.xlane.f32.xlu0 %v2305_v28 }
 0x3ba   :  { %2301 = vadd.xlane.f32.xlu1 %v2300_v30 }
 0x42c   :  { %v2307_v17 = vpop.xlane.xlu0 %2306 }
 0x42d   :  { %v2309_v37 = vmul.f32 %v2307_v17, %v3029_v39  ;;  %v2302_v55 = vpop.xlane.xlu1 %2301 }
 0x42e   :  { %v2308_v56 = vmul.f32 %v2302_v55, %v3029_v39 }
 0x42f   :  { %v2312_v57 = vsub.f32 %v2296_v15, %v2309_v37  ;;  %v2313_v58 = vsub.f32 %v2297_v24, %v2309_v37 }
 0x430   :  { %v2310_v59 = vsub.f32 %v2248_v41, %v2308_v56  ;;  %v2311_v60 = vsub.f32 %v2249_v40, %v2308_v56 }
 0x431   :  { %v2316_v50 = vmul.f32 %v2312_v57, %v2312_v57  ;;  %v2317_v52 = vmul.f32 %v2313_v58, %v2313_v58 }
 0x432   :  { %v2314_v18 = vmul.f32 %v2310_v59, %v2310_v59  ;;  %v2315_v19 = vmul.f32 %v2311_v60, %v2311_v60 }
 0x433   :  { %v2323_v61 = vsel %vm3587_vm6, %v2316_v50, 0.0  ;;  %v2324_v35 = vsel %vm3588_vm13, %v2317_v52, 0.0 }
 0x434   :  { %v2325_v38 = vadd.f32 %v2324_v35, %v2323_v61  ;;  %v2318_v23 = vsel %vm3589_vm2, %v2314_v18, 0.0  ;;  %v2319_v46 = vsel %vm3590_vm4, %v2315_v19, 0.0 }
 0x435   :  { %v2320_v62 = vadd.f32 %v2319_v46, %v2318_v23 }
 0x436   :  { %2326 = vadd.xlane.f32.xlu1 %v2325_v38 }
 0x437   :  { %2321 = vadd.xlane.f32.xlu2 %v2320_v62 }
 0x4a9   :  { %v2327_v42 = vpop.xlane.xlu1 %2326 }
 0x4aa   :  { %v2329_v3 = vmul.f32 %v2327_v42, %v3029_v39  ;;  %v2322_v6 = vpop.xlane.xlu2 %2321 }
 0x4ab   :  { %v2328_v7 = vmul.f32 %v2322_v6, %v3029_v39 }
 0x4ac   :  { %v2331_v53 = vadd.f32 1e-05, %v2329_v3 }
 0x4ad   :  { %v2330_v54 = vadd.f32 1e-05, %v2328_v7 }
 0x4ae   :  { %2562 = vrsqrt.f32 %v2331_v53  ;;  %vm2348_vm9 = vweird.f32 %v2331_v53 }
 0x4af   :  { %2564 = vrsqrt.f32 %v2330_v54  ;;  %vm2338_vm7 = vweird.f32 %v2330_v54 }
 0x4b4   :  { %v2563_v10 = vpop.eup %2562 }
 0x4b5   :  { %v2565_v14 = vpop.eup %2564  ;;  %v2343_v43 = vmul.f32 %v2563_v10, %v2331_v53  ;;  %vm2349_vm15 = vweird.f32 %v2563_v10 }
 0x4b6   :  { %v2333_v11 = vmul.f32 %v2565_v14, %v2330_v54  ;;  %vm2339_vm3 = vweird.f32 %v2565_v14  ;;  %vm2350_vm0 = vmor %vm2348_vm9, %vm2349_vm15 }
 0x4b7   :  { %v2344_v12 = vmul.f32 %v2563_v10, %v2343_v43  ;;  %vm2340_vm12 = vmor %vm2338_vm7, %vm2339_vm3 }
 0x4b8   :  { %v2334_v22 = vmul.f32 %v2565_v14, %v2333_v11 }
 0x4b9   :  { %v2345_v20 = vmul.f32 0.5, %v2344_v12 }
 0x4ba   :  { %v2335_v21 = vmul.f32 0.5, %v2334_v22 }
 0x4bb   :  { %v2346_v26 = vsub.f32 1.5, %v2345_v20 }
 0x4bc   :  { %v2336_v63 = vsub.f32 1.5, %v2335_v21 }
 0x4bd   :  { %v2347_v0 = vmul.f32 %v2563_v10, %v2346_v26 }
 0x4be   :  { %v2337_v39 = vmul.f32 %v2565_v14, %v2336_v63 }
 0x4bf   :  { %v2351_v5 = vsel %vm2350_vm0, %v2563_v10, %v2347_v0 }
 0x4c0   :  { %v2354_v49 = vmul.f32 %v2351_v5, %v2312_v57  ;;  %v2355_v51 = vmul.f32 %v2351_v5, %v2313_v58  ;;  %v2341_v29 = vsel %vm2340_vm12, %v2565_v14, %v2337_v39 }
 0x4c1   :  { %v2352_v8 = vmul.f32 %v2341_v29, %v2310_v59  ;;  %v2353_v9 = vmul.f32 %v2341_v29, %v2311_v60 }
 0x4c2   :  { %v2370_v32 = vadd.f32 %v2362_v4, %v2355_v51  ;;  %v2369_v2 = vadd.f32 %v2361_v31, %v2354_v49 }
 0x4c3   :  { %v2368_v1 = vadd.f32 %v2358_v27, %v2353_v9  ;;  %v2367_v16 = vadd.f32 %v2357_v33, %v2352_v8 }
 0x4c4   :  { %v2376_v13 = vrot.slane %v2370_v32, 4 }
 0x4c5   :  { %v2375_v36 = vrot.slane %v2368_v1, 4 }
 0x4c6   :  { %v2378_v15 = vsel %vm3591_vm5, %v2369_v2, %v2376_v13 }
 0x4c7   :  { %2382 = vst [vmem:[%s3373_s3 + $0x8] sm:$0xff] %v2378_v15  ;;  %v2377_v24 = vsel %vm3592_vm10, %v2367_v16, %v2375_v36 }
 0x4c8   :  { %2381 = vst [vmem:[%s3373_s3] sm:$0xff] %v2377_v24 }

</bundles_post_ra>
